<compile_context>
chip_gen: v6e
topology: v6e:2x2x1
jax: 0.10.0
libtpu: 0.0.40
codegen_flags: <defaults>
</compile_context>

<pallas_src>
import functools
import math

import jax
import jax.numpy as jnp
from jax.experimental import pallas as pl
from jax.experimental.pallas import tpu as pltpu


def _round_up(x, m):
    return ((x + m - 1) // m) * m


def _padded_tile_bytes(rows, cols, itemsize):
    # VMEM footprint of a 2-D tile after (8, 128) layout padding.
    return _round_up(max(int(rows), 1), 8) * _round_up(max(int(cols), 1), 128) * itemsize


# ----------------------------- Pallas kernel ---------------------------------
def egc_kernel(
    h0_ref, x0_ref,                    # initial node features (N, Dn) / coords (N, Dc)
    gi_ref, gj_ref,                    # one-hot incidence tiles (E_t, N): dst / src rows
    git_ref,                           # pre-transposed dst incidence (N, E_t) for the scatter
    inv_deg_ref,                       # (N, 1) = 1/max(deg,1) for scatter-mean
    pwi_ref, pwj_ref, mw1r_ref, mb1_ref, mw2_ref, mb2_ref,    # edge_mlp
    cw1_ref, cb1_ref, cw2r_ref,                                # coord_mlp (cw2 as (1, Dm))
    nw1h_ref, nw1m_ref, nb1_ref, nw2_ref, nb2_ref,             # node_mlp
    out_ref,                           # packed output (N, Dc+Dn) = [x | h], last step only
    h_state, x_state, agg_acc, si_slab, sj_slab, msg_slab,     # VMEM scratch
):
    f32 = jnp.float32
    dm = mw2_ref.shape[0]
    dc = x_state.shape[1]
    step = pl.program_id(0)
    et = pl.program_id(1)
    n_et = pl.num_programs(1)

    # Initialise the persistent node state on the very first grid point.
    @pl.when(jnp.logical_and(step == 0, et == 0))
    def _():
        h_state[...] = h0_ref[...].astype(f32)
        x_state[...] = x0_ref[...].astype(f32)

    # Zero the packed scatter accumulator at the start of every step.
    @pl.when(et == 0)
    def _():
        agg_acc[...] = jnp.zeros_like(agg_acc)

    h = h_state[...]
    x = x_state[...]

    # --- per-node packed gather slabs: fold edge-MLP layer 1 into the gather.
    #     si_slab = [h @ W1_dst | x], sj_slab = [h @ W1_src | x]  -> (N, Dm+Dc)
    si_slab[:, :dm] = jnp.dot(h, pwi_ref[...], preferred_element_type=f32)
    si_slab[:, dm:] = x
    sj_slab[:, :dm] = jnp.dot(h, pwj_ref[...], preferred_element_type=f32)
    sj_slab[:, dm:] = x

    # astype is a no-op in resident (f32) mode; in streamed mode it upcasts the exact
    # {0,1} bf16 incidence tile.
    gi = gi_ref[...].astype(f32)
    gj = gj_ref[...].astype(f32)
    git = git_ref[...].astype(f32)

    # --- per-edge gathers (one-hot matmuls on the MXU), lane-dense packed outputs ---
    g_i = jnp.dot(gi, si_slab[...], preferred_element_type=f32)   # (E_t, Dm+Dc)
    g_j = jnp.dot(gj, sj_slab[...], preferred_element_type=f32)   # (E_t, Dm+Dc)

    diff = g_i[:, dm:] - g_j[:, dm:]                               # (E_t, Dc) = x[dst]-x[src]
    radial = jnp.sum(diff * diff, axis=-1, keepdims=True)          # (E_t, 1)

    # --- edge MLP (layer 1 already folded into the gathers) ---
    m = jnp.tanh(g_i[:, :dm] + g_j[:, :dm] + radial * mw1r_ref[...] + mb1_ref[...])
    m = jnp.tanh(jnp.dot(m, mw2_ref[...], preferred_element_type=f32) + mb2_ref[...])

    # --- coord MLP; the Dm->1 gate runs on VPU+XLU (multiply + lane reduce), not the MXU ---
    c1 = jnp.tanh(jnp.dot(m, cw1_ref[...], preferred_element_type=f32) + cb1_ref[...])
    gate = jnp.tanh(jnp.sum(c1 * cw2r_ref[...], axis=-1, keepdims=True))   # (E_t, 1)
    coord_msg = diff * gate                                                # (E_t, Dc)

    # --- packed scatter-add at dst: one matmul against the pre-transposed incidence.
    #     Padded edges are zero columns of giT -> contribute nothing. ---
    msg_slab[:, :dm] = m
    msg_slab[:, dm:] = coord_msg
    agg_acc[...] += jnp.dot(git, msg_slab[...], preferred_element_type=f32)  # (N, Dm+Dc)

    # --- finalize the step after the last edge tile ---
    @pl.when(et == n_et - 1)
    def _():
        agg = agg_acc[...]
        magg = agg[:, :dm]
        csum = agg[:, dm:]
        x_new = x + inv_deg_ref[...] * csum                        # scatter-mean
        n1 = jnp.tanh(jnp.dot(h, nw1h_ref[...], preferred_element_type=f32)
                      + jnp.dot(magg, nw1m_ref[...], preferred_element_type=f32)
                      + nb1_ref[...])
        h_new = h + jnp.dot(n1, nw2_ref[...], preferred_element_type=f32) + nb2_ref[...]
        x_state[...] = x_new
        h_state[...] = h_new

    # --- write the packed output once, on the very last grid point ---
    @pl.when(jnp.logical_and(et == n_et - 1, step == pl.num_programs(0) - 1))
    def _():
        out_ref[:, :dc] = x_state[...].astype(out_ref.dtype)
        out_ref[:, dc:] = h_state[...].astype(out_ref.dtype)


# ------------------------------ wrapper ---------------------------------------
@functools.partial(jax.jit, static_argnames=("n_steps", "e_tile"))
def encoder_egnca_forward(edge_index, coord, node_feat, params, n_steps=1, e_tile=None):
    """edge_index: (2, E) int32; coord: (N, Dc) f32; node_feat: (N, Dn) f32."""
    n, dc = coord.shape
    dn = node_feat.shape[1]
    dm = params["mw2"].shape[0]
    e = edge_index.shape[1]
    src, dst = edge_index[0], edge_index[1]

    # --- incidence layout decision: full-VMEM residency (f32, DMA'd once) vs bf16 tiles ---
    budget = 24 * 1024 * 1024            # incidence VMEM budget; safe on v5e/v6e/v7x
    e_pad8 = _round_up(e, 8)
    resident_bytes = 2 * (2 * _padded_tile_bytes(e_pad8, n, 4)
                          + _padded_tile_bytes(n, e_pad8, 4))

    if e_tile is None:
        use_resident = resident_bytes <= budget
        e_tile_eff = e_pad8
        if not use_resident:
            e_tile_eff = 128
            for cand in (2048, 1024, 512, 256, 128):
                if 2 * (2 * _padded_tile_bytes(cand, n, 2)
                        + _padded_tile_bytes(n, cand, 2)) <= budget:
                    e_tile_eff = cand
                    break
    else:
        e_tile_eff = max(int(e_tile), 1)
        if e_tile_eff >= e_pad8:
            use_resident = True
            e_tile_eff = e_pad8
        else:
            # the pre-transposed scatter operand puts edges on lanes -> tile must be 128-aligned
            e_tile_eff = max(_round_up(e_tile_eff, 128), 128)
            use_resident = e_tile_eff >= e_pad8
            if use_resident:
                e_tile_eff = e_pad8

    if use_resident:
        e_pad = e_pad8
        inc_dtype = jnp.float32          # resident: no per-tile cast, single DMA
    else:
        e_pad = _round_up(e, e_tile_eff)
        inc_dtype = jnp.bfloat16         # streamed: half the HBM restream, {0,1} exact
    n_et = e_pad // e_tile_eff

    # --- incidence matrices (padded edges = all-zero rows/columns -> contribute nothing;
    #     out-of-range indices are silently dropped the same way) ---
    gi = jax.nn.one_hot(dst, n, dtype=inc_dtype)                  # (E, N) picks dst rows
    gj = jax.nn.one_hot(src, n, dtype=inc_dtype)                  # (E, N) picks src rows
    if e_pad > e:
        zpad = jnp.zeros((e_pad - e, n), inc_dtype)
        gi = jnp.concatenate([gi, zpad], axis=0)
        gj = jnp.concatenate([gj, zpad], axis=0)
    git = gi.T                                                    # (N, E_pad) scatter operand

    deg = jnp.zeros((n,), jnp.float32).at[dst].add(1.0)
    inv_deg = (1.0 / jnp.maximum(deg, 1.0))[:, None]              # (N, 1)

    weights = (params["mw1i"], params["mw1j"], params["mw1r"], params["mb1"],
               params["mw2"], params["mb2"],
               params["cw1"], params["cb1"], params["cw2"].reshape(1, dm),
               params["nw1h"], params["nw1m"], params["nb1"],
               params["nw2"], params["nb2"])

    def const2d(shape):
        # constant block index -> DMA'd once, resident across the whole grid
        return pl.BlockSpec(shape, lambda s, t: (0, 0))

    in_specs = [
        const2d((n, dn)),                                          # h0
        const2d((n, dc)),                                          # x0
        pl.BlockSpec((e_tile_eff, n), lambda s, t: (t, 0)),        # gi edge tile
        pl.BlockSpec((e_tile_eff, n), lambda s, t: (t, 0)),        # gj edge tile
        pl.BlockSpec((n, e_tile_eff), lambda s, t: (0, t)),        # giT edge tile (transposed)
        const2d((n, 1)),                                           # inv_deg
    ] + [const2d(tuple(w.shape)) for w in weights]

    out_specs = const2d((n, dc + dn))                              # packed [x | h]

    scratch_shapes = [
        pltpu.VMEM((n, dn), jnp.float32),            # h_state (carried across steps)
        pltpu.VMEM((n, dc), jnp.float32),            # x_state
        pltpu.VMEM((n, dm + dc), jnp.float32),       # packed scatter accumulator
        pltpu.VMEM((n, dm + dc), jnp.float32),       # si_slab  [h@W1_dst | x]
        pltpu.VMEM((n, dm + dc), jnp.float32),       # sj_slab  [h@W1_src | x]
        pltpu.VMEM((e_tile_eff, dm + dc), jnp.float32),  # packed edge message slab
    ]

    # --- VMEM budget / limit ---
    inc_item = 4 if use_resident else 2
    inc_vmem = 2 * (2 * _padded_tile_bytes(e_tile_eff, n, inc_item)
                    + _padded_tile_bytes(n, e_tile_eff, inc_item))
    weight_vmem = 2 * sum(_padded_tile_bytes(w.shape[0], w.shape[1], 4) for w in weights)
    misc_vmem = (3 * _padded_tile_bytes(n, dm + dc, 4)
                 + _padded_tile_bytes(e_tile_eff, dm + dc, 4)
                 + _padded_tile_bytes(n, dn, 4) + _padded_tile_bytes(n, dc, 4)
                 + 2 * (_padded_tile_bytes(n, dn, 4) + _padded_tile_bytes(n, dc, 4)
                        + _padded_tile_bytes(n, 1, 4) + _padded_tile_bytes(n, dc + dn, 4)))
    est_vmem = inc_vmem + weight_vmem + misc_vmem
    vmem_limit = 64 * 1024 * 1024 if est_vmem > 24 * 1024 * 1024 else 32 * 1024 * 1024

    # --- advisory cost estimate (counts the per-step restream when streaming) ---
    weight_elems = sum(int(math.prod(w.shape)) for w in weights)
    flops_step = (
        4 * n * dn * dm                               # per-node gather-slab projections
        + 4 * e_pad * n * (dm + dc)                   # two packed gathers
        + 2 * e_pad * dm * dm                         # edge MLP layer 2
        + 2 * e_pad * dm * dm + 2 * e_pad * dm        # coord MLP layer 1 + VPU gate
        + 2 * e_pad * n * (dm + dc)                   # packed scatter
        + 2 * n * (dn * dm + dm * dm + dm * dn)       # node MLP
    )
    trans_step = e_pad * (3 * dm + 1) + n * dm
    inc_bytes = 3 * e_pad * n * inc_item
    bytes_acc = (inc_bytes * (1 if use_resident else n_steps)
                 + (n * (dn + dc) + n * (dc + dn) + n) * 4
                 + weight_elems * 4)
    cost = pl.CostEstimate(flops=int(n_steps * flops_step),
                           transcendentals=int(n_steps * trans_step),
                           bytes_accessed=int(bytes_acc))

    grid_spec = pltpu.PrefetchScalarGridSpec(
        num_scalar_prefetch=0,
        grid=(n_steps, n_et),
        in_specs=in_specs,
        out_specs=out_specs,
        scratch_shapes=scratch_shapes,
    )

    out = pl.pallas_call(
        egc_kernel,
        out_shape=jax.ShapeDtypeStruct((n, dc + dn), jnp.float32),
        grid_spec=grid_spec,
        compiler_params=pltpu.CompilerParams(
            # steps are sequential and edge tiles accumulate into shared scratch, so both
            # axes are "arbitrary" (node-sharded parallel axis for v7x's 2nd TC: see TODO).
            dimension_semantics=("arbitrary", "arbitrary"),
            vmem_limit_bytes=vmem_limit,
        ),
        cost_estimate=cost,
    )(node_feat, coord, gi, gj, git, inv_deg, *weights)

    return out[:, :dc], out[:, dc:]


# ----------------------------- pure-JAX reference ------------------------------
def reference_forward(edge_index, coord, node_feat, params, n_steps=1):
    src, dst = edge_index[0], edge_index[1]
    n = coord.shape[0]
    x, h = coord, node_feat
    for _ in range(n_steps):
        h_i, h_j = h[dst], h[src]
        diff = x[dst] - x[src]
        radial = jnp.sum(diff * diff, axis=-1, keepdims=True)
        m = jnp.tanh(h_i @ params["mw1i"] + h_j @ params["mw1j"]
                     + radial * params["mw1r"] + params["mb1"])
        m = jnp.tanh(m @ params["mw2"] + params["mb2"])
        c = jnp.tanh(m @ params["cw1"] + params["cb1"])
        c = jnp.tanh(c @ params["cw2"])
        cmsg = diff * c
        csum = jnp.zeros((n, x.shape[1])).at[dst].add(cmsg)
        deg = jnp.maximum(jnp.zeros((n, 1)).at[dst].add(1.0), 1.0)
        x = x + csum / deg
        magg = jnp.zeros((n, m.shape[1])).at[dst].add(m)
        n1 = jnp.tanh(h @ params["nw1h"] + magg @ params["nw1m"] + params["nb1"])
        h = h + (n1 @ params["nw2"] + params["nb2"])
    return x, h


# --------------------------------- main ----------------------------------------
if __name__ == "__main__":
    coord_dim, node_dim, message_dim = 3, 16, 32
    num_nodes = 20
    n_steps = 3

    key = jax.random.PRNGKey(0)
    keys = jax.random.split(key, 16)

    def w(k, shape, scale=0.1):
        return (scale * jax.random.normal(k, shape)).astype(jnp.float32)

    params = {
        # edge_mlp: Linear(2*Dn+1 -> Dm) split into [h_i | h_j | radial], then Linear(Dm->Dm)
        "mw1i": w(keys[0], (node_dim, message_dim)),
        "mw1j": w(keys[1], (node_dim, message_dim)),
        "mw1r": w(keys[2], (1, message_dim)),
        "mb1":  w(keys[3], (1, message_dim)),
        "mw2":  w(keys[4], (message_dim, message_dim)),
        "mb2":  w(keys[5], (1, message_dim)),
        # coord_mlp: Linear(Dm->Dm), tanh, Linear(Dm->1, no bias), tanh
        "cw1":  w(keys[6], (message_dim, message_dim)),
        "cb1":  w(keys[7], (1, message_dim)),
        "cw2":  w(keys[8], (message_dim, 1)),
        # node_mlp: Linear(Dn+Dm -> Dm) split into [h | m_agg], tanh, Linear(Dm->Dn)
        "nw1h": w(keys[9], (node_dim, message_dim)),
        "nw1m": w(keys[10], (message_dim, message_dim)),
        "nb1":  w(keys[11], (1, message_dim)),
        "nw2":  w(keys[12], (message_dim, node_dim)),
        "nb2":  w(keys[13], (1, node_dim)),
    }

    # graph: each node connected to its 5 forward ring neighbours in both directions,
    # plus 3 extra edges -> E = 203 (not a multiple of 8 or 128: exercises edge padding,
    # the 128-aligned tiled path and the multi-tile scatter accumulator).
    idx = jnp.arange(num_nodes, dtype=jnp.int32)
    srcs, dsts = [], []
    for hop in range(1, 6):
        nxt = (idx + hop) % num_nodes
        srcs += [idx, nxt]
        dsts += [nxt, idx]
    srcs.append(jnp.array([0, 7, 11], dtype=jnp.int32))
    dsts.append(jnp.array([5, 2, 19], dtype=jnp.int32))
    src = jnp.concatenate(srcs)
    dst = jnp.concatenate(dsts)
    edge_index = jnp.stack([src, dst], axis=0)                     # (2, 203)

    coord = jax.random.normal(keys[14], (num_nodes, coord_dim), dtype=jnp.float32)
    node_feat = jnp.ones((num_nodes, node_dim), dtype=jnp.float32)  # init_rand_node_feat=False

    ref_coord, ref_feat = reference_forward(edge_index, coord, node_feat, params,
                                            n_steps=n_steps)

    # 1) auto config: full-edge VMEM residency (f32 incidence, DMA'd once, n_et == 1)
    out_coord, out_feat = encoder_egnca_forward(edge_index, coord, node_feat, params,
                                                n_steps=n_steps)
    jax.block_until_ready((out_coord, out_feat))
    assert jnp.allclose(out_coord, ref_coord, atol=1e-3, rtol=1e-3), \
        float(jnp.max(jnp.abs(out_coord - ref_coord)))
    assert jnp.allclose(out_feat, ref_feat, atol=1e-3, rtol=1e-3), \
        float(jnp.max(jnp.abs(out_feat - ref_feat)))

    # 2) forced streaming config: bf16 incidence tiles of 128 edges (n_et == 2, padded edges)
    out_coord2, out_feat2 = encoder_egnca_forward(edge_index, coord, node_feat, params,
                                                  n_steps=n_steps, e_tile=128)
    jax.block_until_ready((out_coord2, out_feat2))
    assert jnp.allclose(out_coord2, ref_coord, atol=1e-3, rtol=1e-3), \
        float(jnp.max(jnp.abs(out_coord2 - ref_coord)))
    assert jnp.allclose(out_feat2, ref_feat, atol=1e-3, rtol=1e-3), \
        float(jnp.max(jnp.abs(out_feat2 - ref_feat)))

    print("KERNEL_OK")
</pallas_src>

<mosaic_0001>
module attributes {stable_mosaic.version = 11 : i64} {
  func.func @egc_kernel(%arg0: i32, %arg1: i32, %arg2: memref<20x16xf32, #tpu.memory_space<vmem>>, %arg3: memref<20x3xf32, #tpu.memory_space<vmem>>, %arg4: memref<208x20xf32, #tpu.memory_space<vmem>>, %arg5: memref<208x20xf32, #tpu.memory_space<vmem>>, %arg6: memref<20x208xf32, #tpu.memory_space<vmem>>, %arg7: memref<20x1xf32, #tpu.memory_space<vmem>>, %arg8: memref<16x32xf32, #tpu.memory_space<vmem>>, %arg9: memref<16x32xf32, #tpu.memory_space<vmem>>, %arg10: memref<1x32xf32, #tpu.memory_space<vmem>>, %arg11: memref<1x32xf32, #tpu.memory_space<vmem>>, %arg12: memref<32x32xf32, #tpu.memory_space<vmem>>, %arg13: memref<1x32xf32, #tpu.memory_space<vmem>>, %arg14: memref<32x32xf32, #tpu.memory_space<vmem>>, %arg15: memref<1x32xf32, #tpu.memory_space<vmem>>, %arg16: memref<1x32xf32, #tpu.memory_space<vmem>>, %arg17: memref<16x32xf32, #tpu.memory_space<vmem>>, %arg18: memref<32x32xf32, #tpu.memory_space<vmem>>, %arg19: memref<1x32xf32, #tpu.memory_space<vmem>>, %arg20: memref<32x16xf32, #tpu.memory_space<vmem>>, %arg21: memref<1x16xf32, #tpu.memory_space<vmem>>, %arg22: memref<20x19xf32, #tpu.memory_space<vmem>>, %arg23: memref<20x16xf32, #tpu.memory_space<vmem>>, %arg24: memref<20x3xf32, #tpu.memory_space<vmem>>, %arg25: memref<20x35xf32, #tpu.memory_space<vmem>>, %arg26: memref<20x35xf32, #tpu.memory_space<vmem>>, %arg27: memref<20x35xf32, #tpu.memory_space<vmem>>, %arg28: memref<208x35xf32, #tpu.memory_space<vmem>>) attributes {dimension_semantics = [#tpu.dimension_semantics<arbitrary>, #tpu.dimension_semantics<arbitrary>], iteration_bounds = array<i64: 3, 1>, scalar_prefetch = 0 : i64, scratch_operands = 6 : i64, tpu.core_type = #tpu.core_type<tc>, window_params = [{pipeline_mode = #tpu.pipeline_mode<synchronous>, transform_indices = @transform_0, window_bounds = array<i64: 20, 16>}, {pipeline_mode = #tpu.pipeline_mode<synchronous>, transform_indices = @transform_1, window_bounds = array<i64: 20, 3>}, {transform_indices = @transform_2, window_bounds = array<i64: 208, 20>}, {transform_indices = @transform_3, window_bounds = array<i64: 208, 20>}, {transform_indices = @transform_4, window_bounds = array<i64: 20, 208>}, {pipeline_mode = #tpu.pipeline_mode<synchronous>, transform_indices = @transform_5, window_bounds = array<i64: 20, 1>}, {pipeline_mode = #tpu.pipeline_mode<synchronous>, transform_indices = @transform_6, window_bounds = array<i64: 16, 32>}, {pipeline_mode = #tpu.pipeline_mode<synchronous>, transform_indices = @transform_7, window_bounds = array<i64: 16, 32>}, {pipeline_mode = #tpu.pipeline_mode<synchronous>, transform_indices = @transform_8, window_bounds = array<i64: 1, 32>}, {pipeline_mode = #tpu.pipeline_mode<synchronous>, transform_indices = @transform_9, window_bounds = array<i64: 1, 32>}, {pipeline_mode = #tpu.pipeline_mode<synchronous>, transform_indices = @transform_10, window_bounds = array<i64: 32, 32>}, {pipeline_mode = #tpu.pipeline_mode<synchronous>, transform_indices = @transform_11, window_bounds = array<i64: 1, 32>}, {pipeline_mode = #tpu.pipeline_mode<synchronous>, transform_indices = @transform_12, window_bounds = array<i64: 32, 32>}, {pipeline_mode = #tpu.pipeline_mode<synchronous>, transform_indices = @transform_13, window_bounds = array<i64: 1, 32>}, {pipeline_mode = #tpu.pipeline_mode<synchronous>, transform_indices = @transform_14, window_bounds = array<i64: 1, 32>}, {pipeline_mode = #tpu.pipeline_mode<synchronous>, transform_indices = @transform_15, window_bounds = array<i64: 16, 32>}, {pipeline_mode = #tpu.pipeline_mode<synchronous>, transform_indices = @transform_16, window_bounds = array<i64: 32, 32>}, {pipeline_mode = #tpu.pipeline_mode<synchronous>, transform_indices = @transform_17, window_bounds = array<i64: 1, 32>}, {pipeline_mode = #tpu.pipeline_mode<synchronous>, transform_indices = @transform_18, window_bounds = array<i64: 32, 16>}, {pipeline_mode = #tpu.pipeline_mode<synchronous>, transform_indices = @transform_19, window_bounds = array<i64: 1, 16>}, {pipeline_mode = #tpu.pipeline_mode<synchronous>, transform_indices = @transform_20, window_bounds = array<i64: 20, 19>}]} {
    %c0_i32 = arith.constant 0 : i32
    %0 = arith.cmpi eq, %arg0, %c0_i32 : i32
    %c0_i32_0 = arith.constant 0 : i32
    %1 = arith.cmpi eq, %arg1, %c0_i32_0 : i32
    %2 = arith.andi %0, %1 : i1
    %3 = arith.extui %2 : i1 to i32
    %c0_i32_1 = arith.constant 0 : i32
    %4 = arith.cmpi ne, %3, %c0_i32_1 : i32
    scf.if %4 {
      %c0_64 = arith.constant 0 : index
      %c0_65 = arith.constant 0 : index
      %78 = vector.load %arg2[%c0_64, %c0_65] : memref<20x16xf32, #tpu.memory_space<vmem>>, vector<20x16xf32>
      %c0_66 = arith.constant 0 : index
      %c0_67 = arith.constant 0 : index
      %79 = vector.load %arg23[%c0_66, %c0_67] : memref<20x16xf32, #tpu.memory_space<vmem>>, vector<20x16xf32>
      tpu.vector_store %arg23[%c0_66, %c0_67], %78 {strides = array<i32>} : memref<20x16xf32, #tpu.memory_space<vmem>>, vector<20x16xf32>,
      %c0_68 = arith.constant 0 : index
      %c0_69 = arith.constant 0 : index
      %80 = vector.load %arg3[%c0_68, %c0_69] : memref<20x3xf32, #tpu.memory_space<vmem>>, vector<20x3xf32>
      %c0_70 = arith.constant 0 : index
      %c0_71 = arith.constant 0 : index
      %81 = vector.load %arg24[%c0_70, %c0_71] : memref<20x3xf32, #tpu.memory_space<vmem>>, vector<20x3xf32>
      tpu.vector_store %arg24[%c0_70, %c0_71], %80 {strides = array<i32>} : memref<20x3xf32, #tpu.memory_space<vmem>>, vector<20x3xf32>,
    } else {
    }
    %c0_i32_2 = arith.constant 0 : i32
    %5 = arith.cmpi eq, %arg1, %c0_i32_2 : i32
    %6 = arith.extui %5 : i1 to i32
    %c0_i32_3 = arith.constant 0 : i32
    %7 = arith.cmpi ne, %6, %c0_i32_3 : i32
    scf.if %7 {
      %cst_64 = arith.constant 0.000000e+00 : f32
      %78 = vector.broadcast %cst_64 : f32 to vector<20x35xf32>
      %c0_65 = arith.constant 0 : index
      %c0_66 = arith.constant 0 : index
      %79 = vector.load %arg25[%c0_65, %c0_66] : memref<20x35xf32, #tpu.memory_space<vmem>>, vector<20x35xf32>
      tpu.vector_store %arg25[%c0_65, %c0_66], %78 {strides = array<i32>} : memref<20x35xf32, #tpu.memory_space<vmem>>, vector<20x35xf32>,
    } else {
    }
    %c0 = arith.constant 0 : index
    %c0_4 = arith.constant 0 : index
    %8 = vector.load %arg23[%c0, %c0_4] : memref<20x16xf32, #tpu.memory_space<vmem>>, vector<20x16xf32>
    %c0_5 = arith.constant 0 : index
    %c0_6 = arith.constant 0 : index
    %9 = vector.load %arg24[%c0_5, %c0_6] : memref<20x3xf32, #tpu.memory_space<vmem>>, vector<20x3xf32>
    %c0_7 = arith.constant 0 : index
    %c0_8 = arith.constant 0 : index
    %10 = vector.load %arg8[%c0_7, %c0_8] : memref<16x32xf32, #tpu.memory_space<vmem>>, vector<16x32xf32>
    %cst = arith.constant dense<0.000000e+00> : vector<20x32xf32>
    %11 = tpu.matmul %8, %10, %cst {dimension_numbers = #tpu.dot_dimension_numbers<[1], [0], [0], [1], [0, 0, 1, 1], [], []>} : vector<20x16xf32>, vector<16x32xf32>, vector<20x32xf32> -> vector<20x32xf32>
    %c0_9 = arith.constant 0 : index
    %c0_10 = arith.constant 0 : index
    %12 = vector.load %arg26[%c0_9, %c0_10] : memref<20x35xf32, #tpu.memory_space<vmem>>, vector<20x32xf32>
    tpu.vector_store %arg26[%c0_9, %c0_10], %11 {strides = array<i32>} : memref<20x35xf32, #tpu.memory_space<vmem>>, vector<20x32xf32>,
    %c0_11 = arith.constant 0 : index
    %c32 = arith.constant 32 : index
    %13 = vector.load %arg26[%c0_11, %c32] : memref<20x35xf32, #tpu.memory_space<vmem>>, vector<20x3xf32>
    tpu.vector_store %arg26[%c0_11, %c32], %9 {strides = array<i32>} : memref<20x35xf32, #tpu.memory_space<vmem>>, vector<20x3xf32>,
    %c0_12 = arith.constant 0 : index
    %c0_13 = arith.constant 0 : index
    %14 = vector.load %arg9[%c0_12, %c0_13] : memref<16x32xf32, #tpu.memory_space<vmem>>, vector<16x32xf32>
    %cst_14 = arith.constant dense<0.000000e+00> : vector<20x32xf32>
    %15 = tpu.matmul %8, %14, %cst_14 {dimension_numbers = #tpu.dot_dimension_numbers<[1], [0], [0], [1], [0, 0, 1, 1], [], []>} : vector<20x16xf32>, vector<16x32xf32>, vector<20x32xf32> -> vector<20x32xf32>
    %c0_15 = arith.constant 0 : index
    %c0_16 = arith.constant 0 : index
    %16 = vector.load %arg27[%c0_15, %c0_16] : memref<20x35xf32, #tpu.memory_space<vmem>>, vector<20x32xf32>
    tpu.vector_store %arg27[%c0_15, %c0_16], %15 {strides = array<i32>} : memref<20x35xf32, #tpu.memory_space<vmem>>, vector<20x32xf32>,
    %c0_17 = arith.constant 0 : index
    %c32_18 = arith.constant 32 : index
    %17 = vector.load %arg27[%c0_17, %c32_18] : memref<20x35xf32, #tpu.memory_space<vmem>>, vector<20x3xf32>
    tpu.vector_store %arg27[%c0_17, %c32_18], %9 {strides = array<i32>} : memref<20x35xf32, #tpu.memory_space<vmem>>, vector<20x3xf32>,
    %c0_19 = arith.constant 0 : index
    %c0_20 = arith.constant 0 : index
    %18 = vector.load %arg4[%c0_19, %c0_20] : memref<208x20xf32, #tpu.memory_space<vmem>>, vector<208x20xf32>
    %c0_21 = arith.constant 0 : index
    %c0_22 = arith.constant 0 : index
    %19 = vector.load %arg5[%c0_21, %c0_22] : memref<208x20xf32, #tpu.memory_space<vmem>>, vector<208x20xf32>
    %c0_23 = arith.constant 0 : index
    %c0_24 = arith.constant 0 : index
    %20 = vector.load %arg6[%c0_23, %c0_24] : memref<20x208xf32, #tpu.memory_space<vmem>>, vector<20x208xf32>
    %c0_25 = arith.constant 0 : index
    %c0_26 = arith.constant 0 : index
    %21 = vector.load %arg26[%c0_25, %c0_26] : memref<20x35xf32, #tpu.memory_space<vmem>>, vector<20x35xf32>
    %cst_27 = arith.constant dense<0.000000e+00> : vector<208x35xf32>
    %22 = tpu.matmul %18, %21, %cst_27 {dimension_numbers = #tpu.dot_dimension_numbers<[1], [0], [0], [1], [0, 0, 1, 1], [], []>} : vector<208x20xf32>, vector<20x35xf32>, vector<208x35xf32> -> vector<208x35xf32>
    %c0_28 = arith.constant 0 : index
    %c0_29 = arith.constant 0 : index
    %23 = vector.load %arg27[%c0_28, %c0_29] : memref<20x35xf32, #tpu.memory_space<vmem>>, vector<20x35xf32>
    %cst_30 = arith.constant dense<0.000000e+00> : vector<208x35xf32>
    %24 = tpu.matmul %19, %23, %cst_30 {dimension_numbers = #tpu.dot_dimension_numbers<[1], [0], [0], [1], [0, 0, 1, 1], [], []>} : vector<208x20xf32>, vector<20x35xf32>, vector<208x35xf32> -> vector<208x35xf32>
    %25 = vector.extract_strided_slice %22 {offsets = [0, 32], sizes = [208, 3], strides = [1, 1]} : vector<208x35xf32> to vector<208x3xf32>
    %26 = vector.extract_strided_slice %24 {offsets = [0, 32], sizes = [208, 3], strides = [1, 1]} : vector<208x35xf32> to vector<208x3xf32>
    %27 = arith.subf %25, %26 : vector<208x3xf32>
    %28 = arith.mulf %27, %27 : vector<208x3xf32>
    %cst_31 = arith.constant dense<0.000000e+00> : vector<208xf32>
    %29 = vector.multi_reduction <add>, %28, %cst_31 [1] : vector<208x3xf32> to vector<208xf32>
    %30 = vector.shape_cast %29 : vector<208xf32> to vector<208x1xf32>
    %31 = vector.extract_strided_slice %22 {offsets = [0, 0], sizes = [208, 32], strides = [1, 1]} : vector<208x35xf32> to vector<208x32xf32>
    %32 = vector.extract_strided_slice %24 {offsets = [0, 0], sizes = [208, 32], strides = [1, 1]} : vector<208x35xf32> to vector<208x32xf32>
    %33 = arith.addf %31, %32 : vector<208x32xf32>
    %c0_32 = arith.constant 0 : index
    %c0_33 = arith.constant 0 : index
    %34 = vector.load %arg10[%c0_32, %c0_33] : memref<1x32xf32, #tpu.memory_space<vmem>>, vector<1x32xf32>
    %35 = vector.broadcast %30 : vector<208x1xf32> to vector<208x32xf32>
    %36 = vector.broadcast %34 : vector<1x32xf32> to vector<208x32xf32>
    %37 = arith.mulf %35, %36 : vector<208x32xf32>
    %38 = arith.addf %33, %37 : vector<208x32xf32>
    %c0_34 = arith.constant 0 : index
    %c0_35 = arith.constant 0 : index
    %39 = vector.load %arg11[%c0_34, %c0_35] : memref<1x32xf32, #tpu.memory_space<vmem>>, vector<1x32xf32>
    %40 = vector.broadcast %39 : vector<1x32xf32> to vector<208x32xf32>
    %41 = arith.addf %38, %40 : vector<208x32xf32>
    %42 = math.tanh %41 : vector<208x32xf32>
    %c0_36 = arith.constant 0 : index
    %c0_37 = arith.constant 0 : index
    %43 = vector.load %arg12[%c0_36, %c0_37] : memref<32x32xf32, #tpu.memory_space<vmem>>, vector<32x32xf32>
    %cst_38 = arith.constant dense<0.000000e+00> : vector<208x32xf32>
    %44 = tpu.matmul %42, %43, %cst_38 {dimension_numbers = #tpu.dot_dimension_numbers<[1], [0], [0], [1], [0, 0, 1, 1], [], []>} : vector<208x32xf32>, vector<32x32xf32>, vector<208x32xf32> -> vector<208x32xf32>
    %c0_39 = arith.constant 0 : index
    %c0_40 = arith.constant 0 : index
    %45 = vector.load %arg13[%c0_39, %c0_40] : memref<1x32xf32, #tpu.memory_space<vmem>>, vector<1x32xf32>
    %46 = vector.broadcast %45 : vector<1x32xf32> to vector<208x32xf32>
    %47 = arith.addf %44, %46 : vector<208x32xf32>
    %48 = math.tanh %47 : vector<208x32xf32>
    %c0_41 = arith.constant 0 : index
    %c0_42 = arith.constant 0 : index
    %49 = vector.load %arg14[%c0_41, %c0_42] : memref<32x32xf32, #tpu.memory_space<vmem>>, vector<32x32xf32>
    %cst_43 = arith.constant dense<0.000000e+00> : vector<208x32xf32>
    %50 = tpu.matmul %48, %49, %cst_43 {dimension_numbers = #tpu.dot_dimension_numbers<[1], [0], [0], [1], [0, 0, 1, 1], [], []>} : vector<208x32xf32>, vector<32x32xf32>, vector<208x32xf32> -> vector<208x32xf32>
    %c0_44 = arith.constant 0 : index
    %c0_45 = arith.constant 0 : index
    %51 = vector.load %arg15[%c0_44, %c0_45] : memref<1x32xf32, #tpu.memory_space<vmem>>, vector<1x32xf32>
    %52 = vector.broadcast %51 : vector<1x32xf32> to vector<208x32xf32>
    %53 = arith.addf %50, %52 : vector<208x32xf32>
    %54 = math.tanh %53 : vector<208x32xf32>
    %c0_46 = arith.constant 0 : index
    %c0_47 = arith.constant 0 : index
    %55 = vector.load %arg16[%c0_46, %c0_47] : memref<1x32xf32, #tpu.memory_space<vmem>>, vector<1x32xf32>
    %56 = vector.broadcast %55 : vector<1x32xf32> to vector<208x32xf32>
    %57 = arith.mulf %54, %56 : vector<208x32xf32>
    %cst_48 = arith.constant dense<0.000000e+00> : vector<208xf32>
    %58 = vector.multi_reduction <add>, %57, %cst_48 [1] : vector<208x32xf32> to vector<208xf32>
    %59 = vector.shape_cast %58 : vector<208xf32> to vector<208x1xf32>
    %60 = math.tanh %59 : vector<208x1xf32>
    %61 = vector.broadcast %60 : vector<208x1xf32> to vector<208x3xf32>
    %62 = arith.mulf %27, %61 : vector<208x3xf32>
    %c0_49 = arith.constant 0 : index
    %c0_50 = arith.constant 0 : index
    %63 = vector.load %arg28[%c0_49, %c0_50] : memref<208x35xf32, #tpu.memory_space<vmem>>, vector<208x32xf32>
    tpu.vector_store %arg28[%c0_49, %c0_50], %48 {strides = array<i32>} : memref<208x35xf32, #tpu.memory_space<vmem>>, vector<208x32xf32>,
    %c0_51 = arith.constant 0 : index
    %c32_52 = arith.constant 32 : index
    %64 = vector.load %arg28[%c0_51, %c32_52] : memref<208x35xf32, #tpu.memory_space<vmem>>, vector<208x3xf32>
    tpu.vector_store %arg28[%c0_51, %c32_52], %62 {strides = array<i32>} : memref<208x35xf32, #tpu.memory_space<vmem>>, vector<208x3xf32>,
    %c0_53 = arith.constant 0 : index
    %c0_54 = arith.constant 0 : index
    %65 = vector.load %arg25[%c0_53, %c0_54] : memref<20x35xf32, #tpu.memory_space<vmem>>, vector<20x35xf32>
    %c0_55 = arith.constant 0 : index
    %c0_56 = arith.constant 0 : index
    %66 = vector.load %arg28[%c0_55, %c0_56] : memref<208x35xf32, #tpu.memory_space<vmem>>, vector<208x35xf32>
    %cst_57 = arith.constant dense<0.000000e+00> : vector<20x35xf32>
    %67 = tpu.matmul %20, %66, %cst_57 {dimension_numbers = #tpu.dot_dimension_numbers<[1], [0], [0], [1], [0, 0, 1, 1], [], []>} : vector<20x208xf32>, vector<208x35xf32>, vector<20x35xf32> -> vector<20x35xf32>
    %68 = arith.addf %65, %67 : vector<20x35xf32>
    %c0_58 = arith.constant 0 : index
    %c0_59 = arith.constant 0 : index
    %69 = vector.load %arg25[%c0_58, %c0_59] : memref<20x35xf32, #tpu.memory_space<vmem>>, vector<20x35xf32>
    tpu.vector_store %arg25[%c0_58, %c0_59], %68 {strides = array<i32>} : memref<20x35xf32, #tpu.memory_space<vmem>>, vector<20x35xf32>,
    %c0_i32_60 = arith.constant 0 : i32
    %70 = arith.cmpi eq, %arg1, %c0_i32_60 : i32
    %71 = arith.extui %70 : i1 to i32
    %c0_i32_61 = arith.constant 0 : i32
    %72 = arith.cmpi ne, %71, %c0_i32_61 : i32
    scf.if %72 {
      %c0_64 = arith.constant 0 : index
      %c0_65 = arith.constant 0 : index
      %78 = vector.load %arg25[%c0_64, %c0_65] : memref<20x35xf32, #tpu.memory_space<vmem>>, vector<20x35xf32>
      %79 = vector.extract_strided_slice %78 {offsets = [0, 0], sizes = [20, 32], strides = [1, 1]} : vector<20x35xf32> to vector<20x32xf32>
      %80 = vector.extract_strided_slice %78 {offsets = [0, 32], sizes = [20, 3], strides = [1, 1]} : vector<20x35xf32> to vector<20x3xf32>
      %c0_66 = arith.constant 0 : index
      %c0_67 = arith.constant 0 : index
      %81 = vector.load %arg7[%c0_66, %c0_67] : memref<20x1xf32, #tpu.memory_space<vmem>>, vector<20x1xf32>
      %82 = vector.broadcast %81 : vector<20x1xf32> to vector<20x3xf32>
      %83 = arith.mulf %82, %80 : vector<20x3xf32>
      %84 = arith.addf %9, %83 : vector<20x3xf32>
      %c0_68 = arith.constant 0 : index
      %c0_69 = arith.constant 0 : index
      %85 = vector.load %arg17[%c0_68, %c0_69] : memref<16x32xf32, #tpu.memory_space<vmem>>, vector<16x32xf32>
      %cst_70 = arith.constant dense<0.000000e+00> : vector<20x32xf32>
      %86 = tpu.matmul %8, %85, %cst_70 {dimension_numbers = #tpu.dot_dimension_numbers<[1], [0], [0], [1], [0, 0, 1, 1], [], []>} : vector<20x16xf32>, vector<16x32xf32>, vector<20x32xf32> -> vector<20x32xf32>
      %c0_71 = arith.constant 0 : index
      %c0_72 = arith.constant 0 : index
      %87 = vector.load %arg18[%c0_71, %c0_72] : memref<32x32xf32, #tpu.memory_space<vmem>>, vector<32x32xf32>
      %cst_73 = arith.constant dense<0.000000e+00> : vector<20x32xf32>
      %88 = tpu.matmul %79, %87, %cst_73 {dimension_numbers = #tpu.dot_dimension_numbers<[1], [0], [0], [1], [0, 0, 1, 1], [], []>} : vector<20x32xf32>, vector<32x32xf32>, vector<20x32xf32> -> vector<20x32xf32>
      %89 = arith.addf %86, %88 : vector<20x32xf32>
      %c0_74 = arith.constant 0 : index
      %c0_75 = arith.constant 0 : index
      %90 = vector.load %arg19[%c0_74, %c0_75] : memref<1x32xf32, #tpu.memory_space<vmem>>, vector<1x32xf32>
      %91 = vector.broadcast %90 : vector<1x32xf32> to vector<20x32xf32>
      %92 = arith.addf %89, %91 : vector<20x32xf32>
      %93 = math.tanh %92 : vector<20x32xf32>
      %c0_76 = arith.constant 0 : index
      %c0_77 = arith.constant 0 : index
      %94 = vector.load %arg20[%c0_76, %c0_77] : memref<32x16xf32, #tpu.memory_space<vmem>>, vector<32x16xf32>
      %cst_78 = arith.constant dense<0.000000e+00> : vector<20x16xf32>
      %95 = tpu.matmul %93, %94, %cst_78 {dimension_numbers = #tpu.dot_dimension_numbers<[1], [0], [0], [1], [0, 0, 1, 1], [], []>} : vector<20x32xf32>, vector<32x16xf32>, vector<20x16xf32> -> vector<20x16xf32>
      %96 = arith.addf %8, %95 : vector<20x16xf32>
      %c0_79 = arith.constant 0 : index
      %c0_80 = arith.constant 0 : index
      %97 = vector.load %arg21[%c0_79, %c0_80] : memref<1x16xf32, #tpu.memory_space<vmem>>, vector<1x16xf32>
      %98 = vector.broadcast %97 : vector<1x16xf32> to vector<20x16xf32>
      %99 = arith.addf %96, %98 : vector<20x16xf32>
      %c0_81 = arith.constant 0 : index
      %c0_82 = arith.constant 0 : index
      %100 = vector.load %arg24[%c0_81, %c0_82] : memref<20x3xf32, #tpu.memory_space<vmem>>, vector<20x3xf32>
      tpu.vector_store %arg24[%c0_81, %c0_82], %84 {strides = array<i32>} : memref<20x3xf32, #tpu.memory_space<vmem>>, vector<20x3xf32>,
      %c0_83 = arith.constant 0 : index
      %c0_84 = arith.constant 0 : index
      %101 = vector.load %arg23[%c0_83, %c0_84] : memref<20x16xf32, #tpu.memory_space<vmem>>, vector<20x16xf32>
      tpu.vector_store %arg23[%c0_83, %c0_84], %99 {strides = array<i32>} : memref<20x16xf32, #tpu.memory_space<vmem>>, vector<20x16xf32>,
    } else {
    }
    %c0_i32_62 = arith.constant 0 : i32
    %73 = arith.cmpi eq, %arg1, %c0_i32_62 : i32
    %c2_i32 = arith.constant 2 : i32
    %74 = arith.cmpi eq, %arg0, %c2_i32 : i32
    %75 = arith.andi %73, %74 : i1
    %76 = arith.extui %75 : i1 to i32
    %c0_i32_63 = arith.constant 0 : i32
    %77 = arith.cmpi ne, %76, %c0_i32_63 : i32
    scf.if %77 {
      %c0_64 = arith.constant 0 : index
      %c0_65 = arith.constant 0 : index
      %78 = vector.load %arg24[%c0_64, %c0_65] : memref<20x3xf32, #tpu.memory_space<vmem>>, vector<20x3xf32>
      %c0_66 = arith.constant 0 : index
      %c0_67 = arith.constant 0 : index
      %79 = vector.load %arg22[%c0_66, %c0_67] : memref<20x19xf32, #tpu.memory_space<vmem>>, vector<20x3xf32>
      tpu.vector_store %arg22[%c0_66, %c0_67], %78 {strides = array<i32>} : memref<20x19xf32, #tpu.memory_space<vmem>>, vector<20x3xf32>,
      %c0_68 = arith.constant 0 : index
      %c0_69 = arith.constant 0 : index
      %80 = vector.load %arg23[%c0_68, %c0_69] : memref<20x16xf32, #tpu.memory_space<vmem>>, vector<20x16xf32>
      %c0_70 = arith.constant 0 : index
      %c3 = arith.constant 3 : index
      %81 = vector.load %arg22[%c0_70, %c3] : memref<20x19xf32, #tpu.memory_space<vmem>>, vector<20x16xf32>
      tpu.vector_store %arg22[%c0_70, %c3], %80 {strides = array<i32>} : memref<20x19xf32, #tpu.memory_space<vmem>>, vector<20x16xf32>,
    } else {
    }
    return
  }
  func.func @transform_0(%arg0: i32, %arg1: i32) -> (i32, i32) {
    %c0_i32 = arith.constant 0 : i32
    %c0_i32_0 = arith.constant 0 : i32
    %c0_i32_1 = arith.constant 0 : i32
    return %c0_i32, %c0_i32_0 : i32, i32
  }
  func.func @transform_1(%arg0: i32, %arg1: i32) -> (i32, i32) {
    %c0_i32 = arith.constant 0 : i32
    %c0_i32_0 = arith.constant 0 : i32
    %c0_i32_1 = arith.constant 0 : i32
    return %c0_i32, %c0_i32_0 : i32, i32
  }
  func.func @transform_2(%arg0: i32, %arg1: i32) -> (i32, i32) {
    %c0_i32 = arith.constant 0 : i32
    %c0_i32_0 = arith.constant 0 : i32
    return %arg1, %c0_i32 : i32, i32
  }
  func.func @transform_3(%arg0: i32, %arg1: i32) -> (i32, i32) {
    %c0_i32 = arith.constant 0 : i32
    %c0_i32_0 = arith.constant 0 : i32
    return %arg1, %c0_i32 : i32, i32
  }
  func.func @transform_4(%arg0: i32, %arg1: i32) -> (i32, i32) {
    %c0_i32 = arith.constant 0 : i32
    %c0_i32_0 = arith.constant 0 : i32
    return %c0_i32, %arg1 : i32, i32
  }
  func.func @transform_5(%arg0: i32, %arg1: i32) -> (i32, i32) {
    %c0_i32 = arith.constant 0 : i32
    %c0_i32_0 = arith.constant 0 : i32
    %c0_i32_1 = arith.constant 0 : i32
    return %c0_i32, %c0_i32_0 : i32, i32
  }
  func.func @transform_6(%arg0: i32, %arg1: i32) -> (i32, i32) {
    %c0_i32 = arith.constant 0 : i32
    %c0_i32_0 = arith.constant 0 : i32
    %c0_i32_1 = arith.constant 0 : i32
    return %c0_i32, %c0_i32_0 : i32, i32
  }
  func.func @transform_7(%arg0: i32, %arg1: i32) -> (i32, i32) {
    %c0_i32 = arith.constant 0 : i32
    %c0_i32_0 = arith.constant 0 : i32
    %c0_i32_1 = arith.constant 0 : i32
    return %c0_i32, %c0_i32_0 : i32, i32
  }
  func.func @transform_8(%arg0: i32, %arg1: i32) -> (i32, i32) {
    %c0_i32 = arith.constant 0 : i32
    %c0_i32_0 = arith.constant 0 : i32
    %c0_i32_1 = arith.constant 0 : i32
    return %c0_i32, %c0_i32_0 : i32, i32
  }
  func.func @transform_9(%arg0: i32, %arg1: i32) -> (i32, i32) {
    %c0_i32 = arith.constant 0 : i32
    %c0_i32_0 = arith.constant 0 : i32
    %c0_i32_1 = arith.constant 0 : i32
    return %c0_i32, %c0_i32_0 : i32, i32
  }
  func.func @transform_10(%arg0: i32, %arg1: i32) -> (i32, i32) {
    %c0_i32 = arith.constant 0 : i32
    %c0_i32_0 = arith.constant 0 : i32
    %c0_i32_1 = arith.constant 0 : i32
    return %c0_i32, %c0_i32_0 : i32, i32
  }
  func.func @transform_11(%arg0: i32, %arg1: i32) -> (i32, i32) {
    %c0_i32 = arith.constant 0 : i32
    %c0_i32_0 = arith.constant 0 : i32
    %c0_i32_1 = arith.constant 0 : i32
    return %c0_i32, %c0_i32_0 : i32, i32
  }
  func.func @transform_12(%arg0: i32, %arg1: i32) -> (i32, i32) {
    %c0_i32 = arith.constant 0 : i32
    %c0_i32_0 = arith.constant 0 : i32
    %c0_i32_1 = arith.constant 0 : i32
    return %c0_i32, %c0_i32_0 : i32, i32
  }
  func.func @transform_13(%arg0: i32, %arg1: i32) -> (i32, i32) {
    %c0_i32 = arith.constant 0 : i32
    %c0_i32_0 = arith.constant 0 : i32
    %c0_i32_1 = arith.constant 0 : i32
    return %c0_i32, %c0_i32_0 : i32, i32
  }
  func.func @transform_14(%arg0: i32, %arg1: i32) -> (i32, i32) {
    %c0_i32 = arith.constant 0 : i32
    %c0_i32_0 = arith.constant 0 : i32
    %c0_i32_1 = arith.constant 0 : i32
    return %c0_i32, %c0_i32_0 : i32, i32
  }
  func.func @transform_15(%arg0: i32, %arg1: i32) -> (i32, i32) {
    %c0_i32 = arith.constant 0 : i32
    %c0_i32_0 = arith.constant 0 : i32
    %c0_i32_1 = arith.constant 0 : i32
    return %c0_i32, %c0_i32_0 : i32, i32
  }
  func.func @transform_16(%arg0: i32, %arg1: i32) -> (i32, i32) {
    %c0_i32 = arith.constant 0 : i32
    %c0_i32_0 = arith.constant 0 : i32
    %c0_i32_1 = arith.constant 0 : i32
    return %c0_i32, %c0_i32_0 : i32, i32
  }
  func.func @transform_17(%arg0: i32, %arg1: i32) -> (i32, i32) {
    %c0_i32 = arith.constant 0 : i32
    %c0_i32_0 = arith.constant 0 : i32
    %c0_i32_1 = arith.constant 0 : i32
    return %c0_i32, %c0_i32_0 : i32, i32
  }
  func.func @transform_18(%arg0: i32, %arg1: i32) -> (i32, i32) {
    %c0_i32 = arith.constant 0 : i32
    %c0_i32_0 = arith.constant 0 : i32
    %c0_i32_1 = arith.constant 0 : i32
    return %c0_i32, %c0_i32_0 : i32, i32
  }
  func.func @transform_19(%arg0: i32, %arg1: i32) -> (i32, i32) {
    %c0_i32 = arith.constant 0 : i32
    %c0_i32_0 = arith.constant 0 : i32
    %c0_i32_1 = arith.constant 0 : i32
    return %c0_i32, %c0_i32_0 : i32, i32
  }
  func.func @transform_20(%arg0: i32, %arg1: i32) -> (i32, i32) {
    %c0_i32 = arith.constant 0 : i32
    %c0_i32_0 = arith.constant 0 : i32
    %c0_i32_1 = arith.constant 0 : i32
    return %c0_i32, %c0_i32_0 : i32, i32
  }
}

</mosaic_0001>

<bundles_post_ra>
// kernel: encoder_egnca_forward.1
= control target key start
LH: loop header
LB: loop body
LE: loop exit
PB: predicated region body
PF: predicated region fallthrough
CT: control target
= control target key end

     0   :  { %s4252_s22 = smov 0   ;;  %s4254_s23 = smov 0   ;;  %s5307_s0 = inlined_call_operand.vmem [shape: f32[20,16], index: 0, kind: input, shape index: {}]   ;;  %s5308_s1 = inlined_call_operand.vmem [shape: f32[20,3], index: 1, kind: input, shape index: {}]   ;;  %s5309_s2 = inlined_call_operand.vmem [shape: f32[208,20], index: 2, kind: input, shape index: {}]   ;;  %s5310_s3 = inlined_call_operand.vmem [shape: f32[208,20], index: 3, kind: input, shape index: {}]   ;;  %s5311_s4 = inlined_call_operand.vmem [shape: f32[20,208], index: 4, kind: input, shape index: {}]   ;;  %s5312_s5 = inlined_call_operand.vmem [shape: f32[20,1], index: 5, kind: input, shape index: {}]   ;;  %s5313_s6 = inlined_call_operand.vmem [shape: f32[16,32], index: 6, kind: input, shape index: {}]   ;;  %s5314_s7 = inlined_call_operand.vmem [shape: f32[16,32], index: 7, kind: input, shape index: {}]   ;;  %s5315_s8 = inlined_call_operand.vmem [shape: f32[1,32], index: 8, kind: input, shape index: {}]   ;;  %s5316_s9 = inlined_call_operand.vmem [shape: f32[1,32], index: 9, kind: input, shape index: {}]   ;;  %s5317_s10 = inlined_call_operand.vmem [shape: f32[32,32], index: 10, kind: input, shape index: {}]   ;;  %s5318_s11 = inlined_call_operand.vmem [shape: f32[1,32], index: 11, kind: input, shape index: {}]   ;;  %s5319_s12 = inlined_call_operand.vmem [shape: f32[32,32], index: 12, kind: input, shape index: {}]   ;;  %s5320_s13 = inlined_call_operand.vmem [shape: f32[1,32], index: 13, kind: input, shape index: {}]   ;;  %s5321_s14 = inlined_call_operand.vmem [shape: f32[1,32], index: 14, kind: input, shape index: {}]   ;;  %s5322_s15 = inlined_call_operand.vmem [shape: f32[16,32], index: 15, kind: input, shape index: {}]   ;;  %s5323_s16 = inlined_call_operand.vmem [shape: f32[32,32], index: 16, kind: input, shape index: {}]   ;;  %s5324_s17 = inlined_call_operand.vmem [shape: f32[1,32], index: 17, kind: input, shape index: {}]   ;;  %s5325_s18 = inlined_call_operand.vmem [shape: f32[32,16], index: 18, kind: input, shape index: {}]   ;;  %s5326_s19 = inlined_call_operand.vmem [shape: f32[1,16], index: 19, kind: input, shape index: {}]   ;;  %s5327_s20 = inlined_call_operand.vmem [shape: f32[20,19], index: 20, kind: output, shape index: {}]  }
   0x1   :  { %5345 = sst [smem:[#allocation14_spill]] %s5307_s0 }
   0x2   :  { %5346 = sst [smem:[#allocation15_spill]] %s5308_s1  ;;  %s4250_s1 = smov 0  }
   0x3   :  { %5347 = sst [smem:[#allocation16_spill]] %s5309_s2 }
   0x4   :  { %5348 = sst [smem:[#allocation17_spill]] %s5310_s3 }
   0x5   :  { %5349 = sst [smem:[#allocation18_spill]] %s5311_s4 }
   0x6 LB: > { %s42_s24 = sadd.s32 1, %s4133_s22  ;;  %p3321_p0 = scmp.ge.s32.totalorder %s4137_s23, 1  ;;  %s4137_s23 = sphi %s4254_s23, %s30_s23   ;;  %s4133_s22 = sphi %s4252_s22, %s5370_s22   ;;  %s4129_s1 = sphi %s4250_s1, %s5369_s1  }
   0x7   : > { %p44_p1 = scmp.ge.s32.totalorder %s42_s24, 3  ;;  %p592_p2 = scmp.lt.s32.totalorder %s4137_s23, 4 }
   0x9   : > { %s5372_s24 = smov (%p44_p1, %s42_s24), 0  ;;  %p593_p3 = pnand %p3321_p0, %p592_p2 }
   0xb   : > { %596 = sbr.rel (%p593_p3) target bundleno = 2214 (0x8a6), region = 100 }
  0x10   : > { %p673_p4 = scmp.eq.s32.totalorder %s4129_s1, 0 }
  0x11   : > { %s5350_s3 = sld [smem:[#allocation14_spill]] (%p673_p4)  ;;  %vm682_vm0 = vcmask (%p673_p4), 130048   ;;  %vm685_vm1 = vcmask (%p673_p4), 125952   ;;  %vm690_vm2 = vcmask (%p673_p4), 23552   ;;  %vm693_vm3 = vcmask (%p673_p4), 19456  }
  0x12   : > { %678 = sbr.rel (!%p673_p4) target bundleno = 28 (0x1c), region = 104  ;;  %s5351_s0 = sld [smem:[#allocation15_spill]] (%p673_p4) }
  0x17   : > { %v679_v0 = vld [vmem:[%s5350_s3] sm:$0xff]  ;;  %v680_v1 = vld [vmem:[%s5350_s3 + $0x8] sm:$0xff]  ;;  %v681_v2 = vld [vmem:[%s5350_s3 + $0x10] sm:$0xf] }
  0x18   : > { %683 = vst.msk [vmem:[#allocation2] sm:$0xff] %vm682_vm0, %v679_v0  ;;  %684 = vst.msk [vmem:[#allocation2 + $0x8] sm:$0xff] %vm682_vm0, %v680_v1  ;;  %v687_v3 = vld [vmem:[%s5351_s0] sm:$0xff]  ;;  %v688_v4 = vld [vmem:[%s5351_s0 + $0x8] sm:$0xff] }
  0x19   : > { %686 = vst.msk [vmem:[#allocation2 + $0x10] sm:$0xf] %vm685_vm1, %v681_v2  ;;  %v689_v5 = vld [vmem:[%s5351_s0 + $0x10] sm:$0xf] }
  0x1a   : > { %691 = vst.msk [vmem:[#allocation3] sm:$0xff] %vm690_vm2, %v687_v3  ;;  %692 = vst.msk [vmem:[#allocation3 + $0x8] sm:$0xff] %vm690_vm2, %v688_v4 }
  0x1b   : > { %694 = vst.msk [vmem:[#allocation3 + $0x10] sm:$0xf] %vm693_vm3, %v689_v5 }
  0x1c PF: > { %v710_v6 = vld [vmem:[%s5313_s6 + $0x8] sm:$0xff]  ;;  %v5334_v8 = vmov 0.0   ;;  %v709_v9 = vld [vmem:[%s5313_s6] sm:$0xff]  ;;  %vm711_vm4 = vcmask 130048   ;;  %vm4140_vm5 = vmmov 0   ;;  %s4141_s26 = smov 32  }
  0x1d   : > { %v824_v7 = vld [vmem:[%s5314_s7 + $0x8] sm:$0xff]  ;;  %3606 = vmatprep.subr.mxu0 %v5334_v8  ;;  %3619 = vmatprep.subr.mxu1 %v5334_v8  ;;  %v823_v10 = vld [vmem:[%s5314_s7] sm:$0xff]  ;;  %s5352_s4 = sld [smem:[#allocation16_spill]]  ;;  %vm972_vm6 = vcmask 162816   ;;  %vm801_vm7 = vcmask 261120   ;;  %vm818_vm8 = vcmask 285952  }
  0x1e   : > { %3607 = vmatpush3.msra.mxu0 %v710_v6  ;;  %3620 = vmatpush3.msra.mxu1 %v824_v7  ;;  %s5353_s21 = sld [smem:[#allocation17_spill]]  ;;  %vm804_vm9 = vcmask 257024   ;;  %vm821_vm10 = vcmask 281856   ;;  %vm1051_vm11 = vcmask 1043456   ;;  %s5342_s0 = smov 96   ;;  %vm1685_vm12 = vcmask 23552  }
  0x1f   : > { %3608 = vmatprep.subr.mxu0 %v5334_v8  ;;  %3621 = vmatprep.subr.mxu1 %v5334_v8  ;;  %v703_v11 = vld [vmem:[#allocation2] sm:$0xff]  ;;  %v704_v14 = vld [vmem:[#allocation2 + $0x8] sm:$0xff]  ;;  %s5361_s28 = sld [smem:[#allocation18_spill]]  ;;  %vm2772_vm13 = vcmask 654336   ;;  %vm698_vm14 = vcmask 285696   ;;  %vm701_vm15 = vcmask 281600  }
  0x20   : > { %3609 = vmatpush3.msra.mxu0 %v709_v9  ;;  %3610 = vmatprep.mubr.msk.f32.mxu0 %vm4140_vm5, %v5334_v8  ;;  %v705_v16 = vld [vmem:[#allocation2 + $0x10] sm:$0xf]  ;;  %s5368_s2 = smov 96   ;;  %vm3208_vm0 = vcmask 19456   ;;  %p3214_p5 = scmp.eq.s32.totalorder %s4129_s1, 2  ;;  %vm3212_vm1 = vcmask 125952  }
  0x21   : > { %3622 = vmatpush3.msra.mxu1 %v823_v10  ;;  %3623 = vmatprep.mubr.msk.f32.mxu1 %vm4140_vm5, %v5334_v8  ;;  %v706_v13 = vld [vmem:[#allocation3] sm:$0xff]  ;;  %v707_v15 = vld [vmem:[#allocation3 + $0x8] sm:$0xff]  ;;  %s4144_s30 = smov (%p3214_p5), 3   ;;  %vm3241_vm2 = vcmask (%p3214_p5), 154648   ;;  %vm3244_vm3 = vcmask (%p3214_p5), 150552  }
  0x22   : > { %v708_v12 = vld [vmem:[#allocation3 + $0x10] sm:$0xf]  ;;  %3611 = vmatmul.mubr.msk.f32.vlgmr.msra.gmra.mxu0 %vm711_vm4, %v703_v11  ;;  %3624 = vmatmul.mubr.msk.f32.vlgmr.msra.gmra.mxu1 %vm711_vm4, %v703_v11 }
  0x23   : > { %3613 = vmatprep.mubr.msk.f32.mxu0 %vm4140_vm5, %v5334_v8  ;;  %3626 = vmatprep.mubr.msk.f32.mxu1 %vm4140_vm5, %v5334_v8  ;;  %v911_v17 = vld [vmem:[%s5352_s4] sm:$0xff]  ;;  %v912_v40 = vld [vmem:[%s5352_s4 + $0x8] sm:$0xff]  ;;  %v913_v42 = vld [vmem:[%s5352_s4 + $0x10] sm:$0xff] }
  0x24   : > { %813 = vrot.lane.b32.xlu0 %v708_v12, %s4141_s26  ;;  %809 = vrot.lane.b32.xlu1 %v706_v13, %s4141_s26  ;;  %v937_v18 = vld [vmem:[%s5353_s21] sm:$0xff]  ;;  %v938_v41 = vld [vmem:[%s5353_s21 + $0x8] sm:$0xff] }
  0x25   : > { %v939_v43 = vld [vmem:[%s5353_s21 + $0x10] sm:$0xff]  ;;  %v914_v44 = vld [vmem:[%s5352_s4 + $0x18] sm:$0xff]  ;;  %v915_v46 = vld [vmem:[%s5352_s4 + $0x20] sm:$0xff] }
  0x26   : > { %3614 = vmatmul.mubr.msk.f32.gmra.mxu0 %vm711_vm4, %v704_v14  ;;  %3627 = vmatmul.mubr.msk.f32.gmra.mxu1 %vm711_vm4, %v704_v14  ;;  %v940_v45 = vld [vmem:[%s5353_s21 + $0x18] sm:$0xff]  ;;  %v941_v47 = vld [vmem:[%s5353_s21 + $0x20] sm:$0xff]  ;;  %v916_v48 = vld [vmem:[%s5352_s4 + $0x28] sm:$0xff] }
  0x27   : > { %3616 = vmatprep.mubr.msk.f32.mxu0 %vm4140_vm5, %v5334_v8  ;;  %3629 = vmatprep.mubr.msk.f32.mxu1 %vm4140_vm5, %v5334_v8  ;;  %v942_v49 = vld [vmem:[%s5353_s21 + $0x28] sm:$0xff]  ;;  %v917_v50 = vld [vmem:[%s5352_s4 + $0x30] sm:$0xff]  ;;  %v918_v52 = vld [vmem:[%s5352_s4 + $0x38] sm:$0xff] }
  0x28   : > { %811 = vrot.lane.b32.xlu0 %v707_v15, %s4141_s26  ;;  %v943_v51 = vld [vmem:[%s5353_s21 + $0x30] sm:$0xff]  ;;  %v944_v53 = vld [vmem:[%s5353_s21 + $0x38] sm:$0xff]  ;;  %v919_v54 = vld [vmem:[%s5352_s4 + $0x40] sm:$0xff] }
  0x29   : > { %v945_v55 = vld [vmem:[%s5353_s21 + $0x40] sm:$0xff]  ;;  %v920_v56 = vld [vmem:[%s5352_s4 + $0x48] sm:$0xff]  ;;  %v921_v58 = vld [vmem:[%s5352_s4 + $0x50] sm:$0xff] }
  0x2a   : > { %3617 = vmatmul.mubr.msk.f32.gmra.mxu0 %vm711_vm4, %v705_v16  ;;  %3630 = vmatmul.mubr.msk.f32.gmra.mxu1 %vm711_vm4, %v705_v16  ;;  %v946_v57 = vld [vmem:[%s5353_s21 + $0x48] sm:$0xff]  ;;  %v947_v59 = vld [vmem:[%s5353_s21 + $0x50] sm:$0xff]  ;;  %v922_v60 = vld [vmem:[%s5352_s4 + $0x58] sm:$0xff] }
  0x2b   : > { %3638 = vmatprep.mubr.msk.f32.mxu0 %vm972_vm6, %v911_v17  ;;  %3683 = vmatprep.mubr.msk.f32.mxu1 %vm972_vm6, %v937_v18  ;;  %v948_v61 = vld [vmem:[%s5353_s21 + $0x58] sm:$0xff]  ;;  %v923_v62 = vld [vmem:[%s5352_s4 + $0x60] sm:$0xff]  ;;  %v924_v0 = vld [vmem:[%s5352_s4 + $0x68] sm:$0xff] }
  0x2c   : > { %v949_v63 = vld [vmem:[%s5353_s21 + $0x60] sm:$0xff]  ;;  %v950_v1 = vld [vmem:[%s5353_s21 + $0x68] sm:$0xff]  ;;  %v925_v2 = vld [vmem:[%s5352_s4 + $0x70] sm:$0xff] }
  0x2d   : > { %v951_v3 = vld [vmem:[%s5353_s21 + $0x70] sm:$0xff]  ;;  %v926_v4 = vld [vmem:[%s5352_s4 + $0x78] sm:$0xff]  ;;  %v927_v6 = vld [vmem:[%s5352_s4 + $0x80] sm:$0xff] }
  0x2e   : > { %v952_v5 = vld [vmem:[%s5353_s21 + $0x78] sm:$0xff]  ;;  %v953_v7 = vld [vmem:[%s5353_s21 + $0x80] sm:$0xff]  ;;  %v928_v9 = vld [vmem:[%s5352_s4 + $0x88] sm:$0xff] }
  0x2f   : > { %v954_v10 = vld [vmem:[%s5353_s21 + $0x88] sm:$0xff]  ;;  %v929_v11 = vld [vmem:[%s5352_s4 + $0x90] sm:$0xff]  ;;  %v930_v13 = vld [vmem:[%s5352_s4 + $0x98] sm:$0xff] }
  0x30   : > { %v955_v12 = vld [vmem:[%s5353_s21 + $0x90] sm:$0xff]  ;;  %v956_v14 = vld [vmem:[%s5353_s21 + $0x98] sm:$0xff]  ;;  %v931_v15 = vld [vmem:[%s5352_s4 + $0xa0] sm:$0xff] }
  0x31   : > { %v957_v16 = vld [vmem:[%s5353_s21 + $0xa0] sm:$0xff]  ;;  %v932_v17 = vld [vmem:[%s5352_s4 + $0xa8] sm:$0xff] }
  0x32   : > { %v958_v18 = vld [vmem:[%s5353_s21 + $0xa8] sm:$0xff] }
  0x96   : > { %v814_v19 = vpop.permute.xlu0 %813  ;;  %v810_v20 = vpop.permute.xlu1 %809 }
  0x9a   : > { %v812_v25 = vpop.permute.xlu0 %811 }
  0xe2   : > { %v787_v21 = vpop.f32.mrf.mxu0  ;;  %v891_v22 = vpop.f32.mrf.mxu1 }
  0xe3   : > { %802 = vst.msk [vmem:[#allocation5] sm:$0xff] %vm801_vm7, %v787_v21  ;;  %905 = vst.msk [vmem:[#allocation6] sm:$0xff] %vm801_vm7, %v891_v22  ;;  %v934_v21 = vld [vmem:[%s5352_s4 + $0xb8] sm:$0xff] }
  0xe4   : > { %v3612_v23 = vpop.f32.mrf.mxu0  ;;  %v3625_v24 = vpop.f32.mrf.mxu1  ;;  %819 = vst.msk [vmem:[#allocation5] sm:$0xff] %vm818_vm8, %v810_v20  ;;  %908 = vst.msk [vmem:[#allocation6] sm:$0xff] %vm818_vm8, %v810_v20  ;;  %v959_v20 = vld [vmem:[%s5353_s21 + $0xb0] sm:$0xff]  ;;  %v960_v22 = vld [vmem:[%s5353_s21 + $0xb8] sm:$0xff] }
  0xe5   : > { %v935_v23 = vld [vmem:[%s5352_s4 + $0xc0] sm:$0xff] }
  0xe6   : > { %v792_v26 = vpop.f32.mrf.mxu0  ;;  %v896_v27 = vpop.f32.mrf.mxu1  ;;  %v961_v24 = vld [vmem:[%s5353_s21 + $0xc0] sm:$0xff] }
  0xe7   : > { %803 = vst.msk [vmem:[#allocation5 + $0x8] sm:$0xff] %vm801_vm7, %v792_v26  ;;  %906 = vst.msk [vmem:[#allocation6 + $0x8] sm:$0xff] %vm801_vm7, %v896_v27  ;;  %v962_v26 = vld [vmem:[%s5353_s21 + $0xc8] sm:$0xff] }
  0xe8   : > { %v3615_v28 = vpop.f32.mrf.mxu0  ;;  %v3628_v29 = vpop.f32.mrf.mxu1  ;;  %820 = vst.msk [vmem:[#allocation5 + $0x8] sm:$0xff] %vm818_vm8, %v812_v25  ;;  %909 = vst.msk [vmem:[#allocation6 + $0x8] sm:$0xff] %vm818_vm8, %v812_v25  ;;  %v936_v25 = vld [vmem:[%s5352_s4 + $0xc8] sm:$0xff] }
  0xea   : > { %v797_v30 = vpop.f32.mrf.mxu0  ;;  %v901_v31 = vpop.f32.mrf.mxu1 }
  0xeb   : > { %805 = vst.msk [vmem:[#allocation5 + $0x10] sm:$0xf] %vm804_vm9, %v797_v30  ;;  %907 = vst.msk [vmem:[#allocation6 + $0x10] sm:$0xf] %vm804_vm9, %v901_v31  ;;  %v969_v38 = vld [vmem:[#allocation5] sm:$0xff]  ;;  %v1250_v39 = vld [vmem:[#allocation6] sm:$0xff] }
  0xec   : > { %822 = vst.msk [vmem:[#allocation5 + $0x10] sm:$0xf] %vm821_vm10, %v814_v19  ;;  %910 = vst.msk [vmem:[#allocation6 + $0x10] sm:$0xf] %vm821_vm10, %v814_v19  ;;  %v3618_v32 = vpop.f32.mrf.mxu0  ;;  %v3631_v33 = vpop.f32.mrf.mxu1  ;;  %v933_v19 = vld [vmem:[%s5352_s4 + $0xb0] sm:$0xff] }
  0xef   : > { %v970_v34 = vld [vmem:[#allocation5 + $0x8] sm:$0xff]  ;;  %v1251_v37 = vld [vmem:[#allocation6 + $0x8] sm:$0xff] }
  0xf3   : > { %v971_v35 = vld [vmem:[#allocation5 + $0x10] sm:$0xf]  ;;  %v1252_v36 = vld [vmem:[#allocation6 + $0x10] sm:$0xf] }
  0xf4   : > { %3632 = vmatprep.subr.msk.mxu0 %vm1051_vm11, %v971_v35  ;;  %3677 = vmatprep.subr.msk.mxu1 %vm1051_vm11, %v1252_v36 }
  0xf5   : > { %3633 = vmatpush3.msk.msra.mxu0 %vm1051_vm11, %v971_v35  ;;  %3678 = vmatpush3.msk.msra.mxu1 %vm1051_vm11, %v1252_v36 }
  0xf6   : > { %3634 = vmatprep.subr.mxu0 %v970_v34  ;;  %3679 = vmatprep.subr.mxu1 %v1251_v37 }
  0xf7   : > { %3635 = vmatpush3.msra.mxu0 %v970_v34  ;;  %3680 = vmatpush3.msra.mxu1 %v1251_v37 }
  0xf8   : > { %3636 = vmatprep.subr.mxu0 %v969_v38  ;;  %3681 = vmatprep.subr.mxu1 %v1250_v39 }
  0xf9   : > { %3637 = vmatpush3.msra.mxu0 %v969_v38  ;;  %3682 = vmatpush3.msra.mxu1 %v1250_v39 }
  0xfa   : > { %3639 = vmatmul.mubr.msk.f32.vlgmr.msra.gmra.mxu0 %vm972_vm6, %v912_v40  ;;  %3684 = vmatmul.mubr.msk.f32.vlgmr.msra.gmra.mxu1 %vm972_vm6, %v938_v41 }
  0xfb   : > { %3641 = vmatprep.mubr.msk.f32.mxu0 %vm972_vm6, %v913_v42  ;;  %3686 = vmatprep.mubr.msk.f32.mxu1 %vm972_vm6, %v939_v43 }
  0xfe   : > { %3642 = vmatmul.mubr.msk.f32.gmra.mxu0 %vm972_vm6, %v914_v44  ;;  %3687 = vmatmul.mubr.msk.f32.gmra.mxu1 %vm972_vm6, %v940_v45 }
  0xff   : > { %3644 = vmatprep.mubr.msk.f32.mxu0 %vm972_vm6, %v915_v46  ;;  %3689 = vmatprep.mubr.msk.f32.mxu1 %vm972_vm6, %v941_v47 }
 0x102   : > { %3645 = vmatmul.mubr.msk.f32.gmra.mxu0 %vm972_vm6, %v916_v48  ;;  %3690 = vmatmul.mubr.msk.f32.gmra.mxu1 %vm972_vm6, %v942_v49 }
 0x103   : > { %3647 = vmatprep.mubr.msk.f32.mxu0 %vm972_vm6, %v917_v50  ;;  %3692 = vmatprep.mubr.msk.f32.mxu1 %vm972_vm6, %v943_v51 }
 0x106   : > { %3648 = vmatmul.mubr.msk.f32.gmra.mxu0 %vm972_vm6, %v918_v52  ;;  %3693 = vmatmul.mubr.msk.f32.gmra.mxu1 %vm972_vm6, %v944_v53 }
 0x107   : > { %3650 = vmatprep.mubr.msk.f32.mxu0 %vm972_vm6, %v919_v54  ;;  %3695 = vmatprep.mubr.msk.f32.mxu1 %vm972_vm6, %v945_v55 }
 0x10a   : > { %3651 = vmatmul.mubr.msk.f32.gmra.mxu0 %vm972_vm6, %v920_v56  ;;  %3696 = vmatmul.mubr.msk.f32.gmra.mxu1 %vm972_vm6, %v946_v57 }
 0x10b   : > { %3653 = vmatprep.mubr.msk.f32.mxu0 %vm972_vm6, %v921_v58  ;;  %3698 = vmatprep.mubr.msk.f32.mxu1 %vm972_vm6, %v947_v59 }
 0x10e   : > { %3654 = vmatmul.mubr.msk.f32.gmra.mxu0 %vm972_vm6, %v922_v60  ;;  %3699 = vmatmul.mubr.msk.f32.gmra.mxu1 %vm972_vm6, %v948_v61 }
 0x10f   : > { %3656 = vmatprep.mubr.msk.f32.mxu0 %vm972_vm6, %v923_v62  ;;  %3701 = vmatprep.mubr.msk.f32.mxu1 %vm972_vm6, %v949_v63 }
 0x112   : > { %3657 = vmatmul.mubr.msk.f32.gmra.mxu0 %vm972_vm6, %v924_v0  ;;  %3702 = vmatmul.mubr.msk.f32.gmra.mxu1 %vm972_vm6, %v950_v1 }
 0x113   : > { %3659 = vmatprep.mubr.msk.f32.mxu0 %vm972_vm6, %v925_v2  ;;  %3704 = vmatprep.mubr.msk.f32.mxu1 %vm972_vm6, %v951_v3 }
 0x116   : > { %3660 = vmatmul.mubr.msk.f32.gmra.mxu0 %vm972_vm6, %v926_v4  ;;  %3705 = vmatmul.mubr.msk.f32.gmra.mxu1 %vm972_vm6, %v952_v5 }
 0x117   : > { %3662 = vmatprep.mubr.msk.f32.mxu0 %vm972_vm6, %v927_v6  ;;  %3707 = vmatprep.mubr.msk.f32.mxu1 %vm972_vm6, %v953_v7 }
 0x11a   : > { %3663 = vmatmul.mubr.msk.f32.gmra.mxu0 %vm972_vm6, %v928_v9  ;;  %3708 = vmatmul.mubr.msk.f32.gmra.mxu1 %vm972_vm6, %v954_v10 }
 0x11b   : > { %3665 = vmatprep.mubr.msk.f32.mxu0 %vm972_vm6, %v929_v11  ;;  %3710 = vmatprep.mubr.msk.f32.mxu1 %vm972_vm6, %v955_v12 }
 0x11e   : > { %3666 = vmatmul.mubr.msk.f32.gmra.mxu0 %vm972_vm6, %v930_v13  ;;  %3711 = vmatmul.mubr.msk.f32.gmra.mxu1 %vm972_vm6, %v956_v14 }
 0x11f   : > { %3668 = vmatprep.mubr.msk.f32.mxu0 %vm972_vm6, %v931_v15  ;;  %3713 = vmatprep.mubr.msk.f32.mxu1 %vm972_vm6, %v957_v16 }
 0x122   : > { %3669 = vmatmul.mubr.msk.f32.gmra.mxu0 %vm972_vm6, %v932_v17  ;;  %3714 = vmatmul.mubr.msk.f32.gmra.mxu1 %vm972_vm6, %v958_v18 }
 0x123   : > { %3671 = vmatprep.mubr.msk.f32.mxu0 %vm972_vm6, %v933_v19  ;;  %3716 = vmatprep.mubr.msk.f32.mxu1 %vm972_vm6, %v959_v20 }
 0x126   : > { %3672 = vmatmul.mubr.msk.f32.gmra.mxu0 %vm972_vm6, %v934_v21  ;;  %3717 = vmatmul.mubr.msk.f32.gmra.mxu1 %vm972_vm6, %v960_v22 }
 0x127   : > { %3674 = vmatprep.mubr.msk.f32.mxu0 %vm972_vm6, %v935_v23  ;;  %3719 = vmatprep.mubr.msk.f32.mxu1 %vm972_vm6, %v961_v24 }
 0x12a   : > { %3675 = vmatmul.mubr.msk.f32.gmra.mxu0 %vm972_vm6, %v936_v25  ;;  %3720 = vmatmul.mubr.msk.f32.gmra.mxu1 %vm972_vm6, %v962_v26 }
 0x1ba   : > { %v3640_v27 = vpop.f32.mrf.mxu0  ;;  %v3685_v28 = vpop.f32.mrf.mxu1 }
 0x1bb   : > { %v4539_v29 = vsub.f32 %v3640_v27, %v3685_v28  ;;  %v4541_v30 = vadd.f32 %v3685_v28, %v3640_v27 }
 0x1bc   : > { %v1121_v31 = vpop.f32.mrf.mxu0  ;;  %v1400_v32 = vpop.f32.mrf.mxu1 }
 0x1bd   : > { %v1556_v33 = vmul.f32 %v4539_v29, %v4539_v29  ;;  %v4545_v34 = vsub.f32 %v1121_v31, %v1400_v32  ;;  %v4547_v35 = vadd.f32 %v1400_v32, %v1121_v31 }
 0x1be   : > { %v3643_v36 = vpop.f32.mrf.mxu0  ;;  %v3688_v37 = vpop.f32.mrf.mxu1 }
 0x1bf   : > { %v1555_v38 = vmul.f32 %v4545_v34, %v4545_v34  ;;  %v4551_v39 = vsub.f32 %v3643_v36, %v3688_v37  ;;  %v4553_v40 = vadd.f32 %v3688_v37, %v3643_v36  ;;  %1609 = vrot.lane.b32.xlu0 %v1556_v33, %s5342_s0 }
 0x1c0   : > { %v1131_v41 = vpop.f32.mrf.mxu0  ;;  %v1410_v42 = vpop.f32.mrf.mxu1 }
 0x1c1   : > { %v1558_v43 = vmul.f32 %v4551_v39, %v4551_v39  ;;  %1607 = vrot.lane.b32.xlu1 %v1555_v38, %s5342_s0  ;;  %v4559_v44 = vsub.f32 %v1131_v41, %v1410_v42  ;;  %v4561_v45 = vadd.f32 %v1410_v42, %v1131_v41 }
 0x1c2   : > { %v3646_v46 = vpop.f32.mrf.mxu0  ;;  %v3691_v47 = vpop.f32.mrf.mxu1 }
 0x1c3   : > { %v1557_v48 = vmul.f32 %v4559_v44, %v4559_v44  ;;  %1613 = vrot.lane.b32.xlu0 %v1558_v43, %s5342_s0  ;;  %v4566_v49 = vsub.f32 %v3646_v46, %v3691_v47  ;;  %v4568_v50 = vadd.f32 %v3691_v47, %v3646_v46 }
 0x1c4   : > { %v1141_v51 = vpop.f32.mrf.mxu0  ;;  %v1420_v52 = vpop.f32.mrf.mxu1 }
 0x1c5   : > { %v1560_v53 = vmul.f32 %v4566_v49, %v4566_v49  ;;  %1611 = vrot.lane.b32.xlu1 %v1557_v48, %s5342_s0  ;;  %v4573_v54 = vsub.f32 %v1141_v51, %v1420_v52  ;;  %v4575_v55 = vadd.f32 %v1420_v52, %v1141_v51 }
 0x1c6   : > { %v3649_v56 = vpop.f32.mrf.mxu0  ;;  %v3694_v57 = vpop.f32.mrf.mxu1 }
 0x1c7   : > { %v1559_v58 = vmul.f32 %v4573_v54, %v4573_v54  ;;  %1617 = vrot.lane.b32.xlu0 %v1560_v53, %s5342_s0  ;;  %v4580_v59 = vsub.f32 %v3649_v56, %v3694_v57  ;;  %v4582_v60 = vadd.f32 %v3694_v57, %v3649_v56 }
 0x1c8   : > { %v1151_v61 = vpop.f32.mrf.mxu0  ;;  %v1430_v62 = vpop.f32.mrf.mxu1 }
 0x1c9   : > { %v1562_v63 = vmul.f32 %v4580_v59, %v4580_v59  ;;  %1615 = vrot.lane.b32.xlu1 %v1559_v58, %s5342_s0  ;;  %v4587_v0 = vsub.f32 %v1151_v61, %v1430_v62  ;;  %v4589_v1 = vadd.f32 %v1430_v62, %v1151_v61 }
 0x1ca   : > { %v3652_v2 = vpop.f32.mrf.mxu0  ;;  %v3697_v3 = vpop.f32.mrf.mxu1 }
 0x1cb   : > { %v1561_v4 = vmul.f32 %v4587_v0, %v4587_v0  ;;  %v4593_v5 = vsub.f32 %v3652_v2, %v3697_v3  ;;  %v4595_v6 = vadd.f32 %v3697_v3, %v3652_v2  ;;  %1621 = vrot.lane.b32.xlu0 %v1562_v63, %s5342_s0 }
 0x1cc   : > { %v1161_v7 = vpop.f32.mrf.mxu0  ;;  %v1440_v9 = vpop.f32.mrf.mxu1 }
 0x1cd   : > { %v1564_v10 = vmul.f32 %v4593_v5, %v4593_v5  ;;  %v4600_v11 = vsub.f32 %v1161_v7, %v1440_v9  ;;  %v4602_v12 = vadd.f32 %v1440_v9, %v1161_v7  ;;  %1619 = vrot.lane.b32.xlu1 %v1561_v4, %s5342_s0 }
 0x1ce   : > { %v3655_v13 = vpop.f32.mrf.mxu0  ;;  %v3700_v14 = vpop.f32.mrf.mxu1 }
 0x1cf   : > { %v1563_v15 = vmul.f32 %v4600_v11, %v4600_v11  ;;  %1625 = vrot.lane.b32.xlu0 %v1564_v10, %s5342_s0  ;;  %v4608_v16 = vsub.f32 %v3655_v13, %v3700_v14  ;;  %v4610_v17 = vadd.f32 %v3700_v14, %v3655_v13 }
 0x1d0   : > { %v1171_v18 = vpop.f32.mrf.mxu0  ;;  %v1450_v19 = vpop.f32.mrf.mxu1 }
 0x1d1   : > { %v1566_v20 = vmul.f32 %v4608_v16, %v4608_v16  ;;  %1623 = vrot.lane.b32.xlu1 %v1563_v15, %s5342_s0  ;;  %v4615_v21 = vsub.f32 %v1171_v18, %v1450_v19  ;;  %v4617_v22 = vadd.f32 %v1450_v19, %v1171_v18 }
 0x1d2   : > { %v3658_v23 = vpop.f32.mrf.mxu0  ;;  %v3703_v24 = vpop.f32.mrf.mxu1 }
 0x1d3   : > { %v1565_v25 = vmul.f32 %v4615_v21, %v4615_v21  ;;  %1629 = vrot.lane.b32.xlu0 %v1566_v20, %s5342_s0  ;;  %v4622_v26 = vsub.f32 %v3658_v23, %v3703_v24  ;;  %v4624_v27 = vadd.f32 %v3703_v24, %v3658_v23 }
 0x1d4   : > { %v1181_v28 = vpop.f32.mrf.mxu0  ;;  %v1460_v31 = vpop.f32.mrf.mxu1 }
 0x1d5   : > { %v1568_v32 = vmul.f32 %v4622_v26, %v4622_v26  ;;  %1627 = vrot.lane.b32.xlu1 %v1565_v25, %s5342_s0  ;;  %v4629_v33 = vsub.f32 %v1181_v28, %v1460_v31  ;;  %v4631_v36 = vadd.f32 %v1460_v31, %v1181_v28 }
 0x1d6   : > { %v3661_v37 = vpop.f32.mrf.mxu0  ;;  %v3706_v38 = vpop.f32.mrf.mxu1 }
 0x1d7   : > { %v1567_v41 = vmul.f32 %v4629_v33, %v4629_v33  ;;  %1633 = vrot.lane.b32.xlu0 %v1568_v32, %s5342_s0  ;;  %v4636_v42 = vsub.f32 %v3661_v37, %v3706_v38  ;;  %v4638_v43 = vadd.f32 %v3706_v38, %v3661_v37 }
 0x1d8   : > { %v1191_v46 = vpop.f32.mrf.mxu0  ;;  %v1470_v47 = vpop.f32.mrf.mxu1 }
 0x1d9   : > { %v1570_v48 = vmul.f32 %v4636_v42, %v4636_v42  ;;  %v4642_v51 = vsub.f32 %v1191_v46, %v1470_v47  ;;  %v4644_v52 = vadd.f32 %v1470_v47, %v1191_v46  ;;  %1631 = vrot.lane.b32.xlu1 %v1567_v41, %s5342_s0 }
 0x1da   : > { %v3664_v53 = vpop.f32.mrf.mxu0  ;;  %v3709_v56 = vpop.f32.mrf.mxu1 }
 0x1db   : > { %v1569_v57 = vmul.f32 %v4642_v51, %v4642_v51  ;;  %v4649_v58 = vsub.f32 %v3664_v53, %v3709_v56  ;;  %v4651_v61 = vadd.f32 %v3709_v56, %v3664_v53  ;;  %1637 = vrot.lane.b32.xlu0 %v1570_v48, %s5342_s0 }
 0x1dc   : > { %v1201_v62 = vpop.f32.mrf.mxu0  ;;  %v1480_v63 = vpop.f32.mrf.mxu1 }
 0x1dd   : > { %5354 = vst [vmem:[#allocation8_spill] sm:$0xff] %v4649_v58  ;;  %1635 = vrot.lane.b32.xlu1 %v1569_v57, %s5342_s0  ;;  %v1572_v2 = vmul.f32 %v4649_v58, %v4649_v58  ;;  %v4657_v3 = vsub.f32 %v1201_v62, %v1480_v63  ;;  %v4659_v4 = vadd.f32 %v1480_v63, %v1201_v62 }
 0x1de   : > { %v3667_v7 = vpop.f32.mrf.mxu0  ;;  %v3712_v9 = vpop.f32.mrf.mxu1 }
 0x1df   : > { %5355 = vst [vmem:[#allocation9_spill] sm:$0xff] %v4657_v3  ;;  %v1571_v10 = vmul.f32 %v4657_v3, %v4657_v3  ;;  %v4663_v13 = vsub.f32 %v3667_v7, %v3712_v9  ;;  %v4665_v14 = vadd.f32 %v3712_v9, %v3667_v7  ;;  %1641 = vrot.lane.b32.xlu0 %v1572_v2, %s5342_s0 }
 0x1e0   : > { %v1211_v15 = vpop.f32.mrf.mxu0  ;;  %v1490_v18 = vpop.f32.mrf.mxu1 }
 0x1e1   : > { %5356 = vst [vmem:[#allocation10_spill] sm:$0xff] %v4663_v13  ;;  %v1574_v19 = vmul.f32 %v4663_v13, %v4663_v13  ;;  %v4670_v20 = vsub.f32 %v1211_v15, %v1490_v18  ;;  %v4672_v23 = vadd.f32 %v1490_v18, %v1211_v15  ;;  %1639 = vrot.lane.b32.xlu1 %v1571_v10, %s5342_s0 }
 0x1e2   : > { %v3715_v24 = vpop.f32.mrf.mxu1  ;;  %v3670_v25 = vpop.f32.mrf.mxu0 }
 0x1e3   : > { %5357 = vst [vmem:[#allocation11_spill] sm:$0xff] %v4670_v20  ;;  %v1573_v28 = vmul.f32 %v4670_v20, %v4670_v20  ;;  %v4677_v31 = vsub.f32 %v3670_v25, %v3715_v24  ;;  %v4679_v32 = vadd.f32 %v3715_v24, %v3670_v25  ;;  %1645 = vrot.lane.b32.xlu0 %v1574_v19, %s5342_s0 }
 0x1e4   : > { %v1221_v37 = vpop.f32.mrf.mxu0  ;;  %v1500_v38 = vpop.f32.mrf.mxu1 }
 0x1e5   : > { %5358 = vst [vmem:[#allocation12_spill] sm:$0xff] %v4677_v31  ;;  %v1576_v41 = vmul.f32 %v4677_v31, %v4677_v31  ;;  %v4684_v46 = vsub.f32 %v1221_v37, %v1500_v38  ;;  %v4686_v47 = vadd.f32 %v1500_v38, %v1221_v37  ;;  %1643 = vrot.lane.b32.xlu1 %v1573_v28, %s5342_s0 }
 0x1e6   : > { %v3718_v48 = vpop.f32.mrf.mxu1  ;;  %v3673_v53 = vpop.f32.mrf.mxu0 }
 0x1e7   : > { %5359 = vst [vmem:[#allocation13_spill] sm:$0xff] %v4684_v46  ;;  %v1575_v56 = vmul.f32 %v4684_v46, %v4684_v46  ;;  %v4691_v57 = vsub.f32 %v3673_v53, %v3718_v48  ;;  %v4693_v62 = vadd.f32 %v3718_v48, %v3673_v53  ;;  %1649 = vrot.lane.b32.xlu0 %v1576_v41, %s5342_s0 }
 0x1e8   : > { %v1231_v63 = vpop.f32.mrf.mxu0  ;;  %v1510_v2 = vpop.f32.mrf.mxu1 }
 0x1e9   : > { %v1578_v7 = vmul.f32 %v4691_v57, %v4691_v57  ;;  %v4698_v9 = vsub.f32 %v1231_v63, %v1510_v2  ;;  %v4700_v10 = vadd.f32 %v1510_v2, %v1231_v63  ;;  %1647 = vrot.lane.b32.xlu1 %v1575_v56, %s5342_s0 }
 0x1ea   : > { %v3721_v15 = vpop.f32.mrf.mxu1  ;;  %v3676_v18 = vpop.f32.mrf.mxu0 }
 0x1eb   : > { %v1577_v19 = vmul.f32 %v4698_v9, %v4698_v9  ;;  %1653 = vrot.lane.b32.xlu0 %v1578_v7, %s5342_s0  ;;  %v4706_v24 = vsub.f32 %v3676_v18, %v3721_v15  ;;  %v4708_v25 = vadd.f32 %v3721_v15, %v3676_v18 }
 0x1ec   : > { %v4710_v28 = vpop.f32.mrf.mxu0  ;;  %v4712_v37 = vpop.f32.mrf.mxu1 }
 0x1ed   : > { %v4716_v38 = vsub.f32 %v4710_v28, %v4712_v37  ;;  %1651 = vrot.lane.b32.xlu1 %v1577_v19, %s5342_s0 }
 0x1ef   : > { %v1579_v41 = vmul.f32 %v4716_v38, %v4716_v38 }
 0x1f1   : > { %1655 = vrot.lane.b32.xlu0 %v1579_v41, %s5342_s0 }
 0x231   : > { %v1610_v48 = vpop.permute.xlu0 %1609 }
 0x232   : > { %v1689_v53 = vsel %vm1685_vm12, %v1610_v48, 0.0 }
 0x233   : > { %v1608_v56 = vpop.permute.xlu1 %1607  ;;  %1690 = vadd.xlane.f32.xlu0 %v1689_v53  ;;  %v1580_v53 = vmul.f32 %v4706_v24, %v4706_v24 }
 0x234   : > { %v1686_v63 = vsel %vm1685_vm12, %v1608_v56, 0.0 }
 0x235   : > { %v1614_v2 = vpop.permute.xlu0 %1613  ;;  %1687 = vadd.xlane.f32.xlu1 %v1686_v63 }
 0x236   : > { %v1695_v7 = vsel %vm1685_vm12, %v1614_v2, 0.0 }
 0x237   : > { %1696 = vadd.xlane.f32.xlu0 %v1695_v7  ;;  %v1612_v15 = vpop.permute.xlu1 %1611 }
 0x238   : > { %v1692_v18 = vsel %vm1685_vm12, %v1612_v15, 0.0 }
 0x239   : > { %v1618_v19 = vpop.permute.xlu0 %1617 }
 0x23a   : > { %v1701_v41 = vsel %vm1685_vm12, %v1618_v19, 0.0 }
 0x23b   : > { %1693 = vadd.xlane.f32.xlu0 %v1692_v18  ;;  %v1616_v8 = vpop.permute.xlu1 %1615  ;;  %v1911_v18 = vld [vmem:[%s5317_s10 + $0x18] sm:$0xff] }
 0x23c   : > { %v1698_v48 = vsel %vm1685_vm12, %v1616_v8, 0.0  ;;  %3722 = vmatprep.subr.mxu0 %v1911_v18 }
 0x23d   : > { %v1622_v3 = vpop.permute.xlu0 %1621  ;;  %3723 = vmatpush3.msra.mxu0 %v1911_v18 }
 0x23e   : > { %v1707_v63 = vsel %vm1685_vm12, %v1622_v3, 0.0  ;;  %v1910_v3 = vld [vmem:[%s5317_s10 + $0x10] sm:$0xff] }
 0x23f   : > { %1702 = vadd.xlane.f32.xlu0 %v1701_v41  ;;  %v1620_v56 = vpop.permute.xlu1 %1619  ;;  %3724 = vmatprep.subr.mxu0 %v1910_v3  ;;  %v1909_v41 = vld [vmem:[%s5317_s10 + $0x8] sm:$0xff] }
 0x240   : > { %3725 = vmatpush3.msra.mxu0 %v1910_v3 }
 0x241   : > { %v1626_v2 = vpop.permute.xlu0 %1625  ;;  %3726 = vmatprep.subr.mxu0 %v1909_v41 }
 0x242   : > { %v1713_v7 = vsel %vm1685_vm12, %v1626_v2, 0.0  ;;  %3727 = vmatpush3.msra.mxu0 %v1909_v41 }
 0x243   : > { %1699 = vadd.xlane.f32.xlu0 %v1698_v48  ;;  %v1624_v15 = vpop.permute.xlu1 %1623 }
 0x244   : > { %v1710_v8 = vsel %vm1685_vm12, %v1624_v15, 0.0 }
 0x245   : > { %v1630_v19 = vpop.permute.xlu0 %1629 }
 0x246   : > { %1657 = vrot.lane.b32.xlu1 %v1580_v53, %s5342_s0  ;;  %v1719_v48 = vsel %vm1685_vm12, %v1630_v19, 0.0 }
 0x247   : > { %1708 = vadd.xlane.f32.xlu0 %v1707_v63  ;;  %v1628_v53 = vpop.permute.xlu1 %1627  ;;  %v1908_v63 = vld [vmem:[%s5317_s10] sm:$0xff] }
 0x248   : > { %3728 = vmatprep.subr.mxu0 %v1908_v63  ;;  %v1716_v2 = vsel %vm1685_vm12, %v1628_v53, 0.0 }
 0x249   : > { %3729 = vmatpush3.msra.mxu0 %v1908_v63  ;;  %v1634_v15 = vpop.permute.xlu0 %1633 }
 0x24b   : > { %1714 = vadd.xlane.f32.xlu0 %v1713_v7  ;;  %v5360_v7 = vmov 0.0   ;;  %v1632_v18 = vpop.permute.xlu1 %1631 }
 0x24c   : > { %2782 = vmatprep.subr.mxu0 %v5360_v7  ;;  %v1722_v3 = vsel %vm1685_vm12, %v1632_v18, 0.0  ;;  %699 = vst.msk [vmem:[#allocation4] sm:$0xff] %vm698_vm14, %v5360_v7  ;;  %700 = vst.msk [vmem:[#allocation4 + $0x8] sm:$0xff] %vm698_vm14, %v5360_v7 }
 0x24d   : > { %v1638_v19 = vpop.permute.xlu0 %1637  ;;  %702 = vst.msk [vmem:[#allocation4 + $0x10] sm:$0xf] %vm701_vm15, %v5360_v7 }
 0x24e   : > { %v1731_v53 = vsel %vm1685_vm12, %v1638_v19, 0.0 }
 0x24f   : > { %1711 = vadd.xlane.f32.xlu0 %v1710_v8  ;;  %v1725_v8 = vsel %vm1685_vm12, %v1634_v15, 0.0  ;;  %v1636_v41 = vpop.permute.xlu1 %1635  ;;  %v1704_v15 = vsel %vm1685_vm12, %v1620_v56, 0.0 }
 0x250   : > { %v1728_v20 = vsel %vm1685_vm12, %v1636_v41, 0.0 }
 0x251   : > { %v1642_v58 = vpop.permute.xlu0 %1641 }
 0x253   : > { %1720 = vadd.xlane.f32.xlu0 %v1719_v48  ;;  %v1640_v48 = vpop.permute.xlu1 %1639 }
 0x254   : > { %v1734_v18 = vsel %vm1685_vm12, %v1640_v48, 0.0 }
 0x255   : > { %v1646_v63 = vpop.permute.xlu0 %1645 }
 0x257   : > { %1717 = vadd.xlane.f32.xlu0 %v1716_v2  ;;  %v1737_v2 = vsel %vm1685_vm12, %v1642_v58, 0.0  ;;  %v1644_v13 = vpop.permute.xlu1 %1643 }
 0x25b   : > { %1726 = vadd.xlane.f32.xlu0 %v1725_v8  ;;  %v1650_v8 = vpop.permute.xlu0 %1649  ;;  %v1648_v41 = vpop.permute.xlu1 %1647 }
 0x25c   : > { %v1749_v19 = vsel %vm1685_vm12, %v1650_v8, 0.0  ;;  %v1746_v58 = vsel %vm1685_vm12, %v1648_v41, 0.0  ;;  %v4772_v41 = vld [vmem:[%s5316_s9] ss:$0 sm:$0xff] }
 0x25f   : > { %1723 = vadd.xlane.f32.xlu0 %v1722_v3  ;;  %v1743_v3 = vsel %vm1685_vm12, %v1646_v63, 0.0 }
 0x263   : > { %1729 = vadd.xlane.f32.xlu0 %v1728_v20  ;;  %v1740_v20 = vsel %vm1685_vm12, %v1644_v13, 0.0  ;;  %v4766_v13 = vld [vmem:[%s5315_s8] ss:$0 sm:$0xff] }
 0x267   : > { %1732 = vadd.xlane.f32.xlu0 %v1731_v53  ;;  %v1654_v53 = vpop.permute.xlu0 %1653 }
 0x268   : > { %v1755_v56 = vsel %vm1685_vm12, %v1654_v53, 0.0 }
 0x26a   : > { %1705 = vadd.xlane.f32.xlu1 %v1704_v15 }
 0x26b   : > { %1738 = vadd.xlane.f32.xlu0 %v1737_v2  ;;  %v1652_v2 = vpop.permute.xlu1 %1651  ;;  %v1656_v63 = vpop.permute.xlu0 %1655 }
 0x26c   : > { %v1752_v48 = vsel %vm1685_vm12, %v1652_v2, 0.0  ;;  %v1758_v15 = vsel %vm1685_vm12, %v1656_v63, 0.0 }
 0x26e   : > { %1735 = vadd.xlane.f32.xlu1 %v1734_v18 }
 0x26f   : > { %1744 = vadd.xlane.f32.xlu0 %v1743_v3 }
 0x272   : > { %1741 = vadd.xlane.f32.xlu1 %v1740_v20 }
 0x273   : > { %1750 = vadd.xlane.f32.xlu0 %v1749_v19 }
 0x276   : > { %1747 = vadd.xlane.f32.xlu1 %v1746_v58 }
 0x277   : > { %1756 = vadd.xlane.f32.xlu0 %v1755_v56 }
 0x27a   : > { %1753 = vadd.xlane.f32.xlu1 %v1752_v48 }
 0x27e   : > { %1759 = vadd.xlane.f32.xlu1 %v1758_v15 }
 0x2bc   : > { %v1691_v18 = vpop.xlane.xlu0 %1690 }
 0x2bd   : > { %v1798_v8 = vmul.f32 %v4766_v13, %v1691_v18 }
 0x2be   : > { %v1688_v3 = vpop.xlane.xlu1 %1687 }
 0x2bf   : > { %v1824_v20 = vadd.f32 %v1798_v8, %v4541_v30  ;;  %v1797_v19 = vmul.f32 %v4766_v13, %v1688_v3 }
 0x2c0   : > { %v1697_v53 = vpop.xlane.xlu0 %1696 }
 0x2c1   : > { %v1823_v58 = vadd.f32 %v1797_v19, %v4547_v35  ;;  %v1800_v56 = vmul.f32 %v4766_v13, %v1697_v53  ;;  %v1857_v2 = vadd.f32 %v4772_v41, %v1824_v20 }
 0x2c2   : > { %v1658_v48 = vpop.permute.xlu1 %1657 }
 0x2c3   : > { %v1856_v63 = vadd.f32 %v4772_v41, %v1823_v58  ;;  %v1761_v15 = vsel %vm1685_vm12, %v1658_v48, 0.0  ;;  %v1826_v18 = vadd.f32 %v1800_v56, %v4553_v40 }
 0x2c4   : > { %1762 = vadd.xlane.f32.xlu0 %v1761_v15  ;;  %v1694_v46 = vpop.xlane.xlu0 %1693 }
 0x2c5   : > { %3895 = vtanh.f32 %v1856_v63  ;;  %v1799_v30 = vmul.f32 %v4766_v13, %v1694_v46  ;;  %v1859_v35 = vadd.f32 %v4772_v41, %v1826_v18 }
 0x2c6   : > { %3897 = vtanh.f32 %v1857_v2 }
 0x2c7   : > { %v1825_v8 = vadd.f32 %v1799_v30, %v4561_v45 }
 0x2c8   : > { %v1703_v3 = vpop.xlane.xlu0 %1702 }
 0x2c9   : > { %v1858_v20 = vadd.f32 %v4772_v41, %v1825_v8  ;;  %v1802_v19 = vmul.f32 %v4766_v13, %v1703_v3 }
 0x2cb   : > { %3899 = vtanh.f32 %v1858_v20  ;;  %v1828_v53 = vadd.f32 %v1802_v19, %v4568_v50 }
 0x2cc   : > { %3901 = vtanh.f32 %v1859_v35  ;;  %v1700_v40 = vpop.xlane.xlu0 %1699 }
 0x2cd   : > { %v1801_v58 = vmul.f32 %v4766_v13, %v1700_v40  ;;  %v1861_v46 = vadd.f32 %v4772_v41, %v1828_v53 }
 0x2cf   : > { %v1827_v56 = vadd.f32 %v1801_v58, %v4575_v55 }
 0x2d0   : > { %v1709_v2 = vpop.xlane.xlu0 %1708 }
 0x2d1   : > { %v1860_v45 = vadd.f32 %v4772_v41, %v1827_v56  ;;  %v1804_v40 = vmul.f32 %v4766_v13, %v1709_v2 }
 0x2d2   : > { %v3896_v48 = vpop.eup %3895 }
 0x2d3   : > { %v3898_v63 = vpop.eup %3897  ;;  %3903 = vtanh.f32 %v1860_v45  ;;  %3730 = vmatprep.mubr.msk.f32.mxu0 %vm801_vm7, %v3896_v48  ;;  %v1830_v56 = vadd.f32 %v1804_v40, %v4582_v60 }
 0x2d4   : > { %3905 = vtanh.f32 %v1861_v46  ;;  %3731 = vmatmul.mubr.msk.f32.vlgmr.msra.gmra.mxu0 %vm801_vm7, %v3898_v63  ;;  %v1715_v15 = vpop.xlane.xlu0 %1714 }
 0x2d5   : > { %v1806_v46 = vmul.f32 %v4766_v13, %v1715_v15 }
 0x2d7   : > { %v1832_v2 = vadd.f32 %v1806_v46, %v4595_v6 }
 0x2d8   : > { %v3900_v50 = vpop.eup %3899  ;;  %v1712_v18 = vpop.xlane.xlu0 %1711 }
 0x2d9   : > { %v3902_v30 = vpop.eup %3901  ;;  %3733 = vmatprep.mubr.msk.f32.mxu0 %vm801_vm7, %v3900_v50  ;;  %v1805_v58 = vmul.f32 %v4766_v13, %v1712_v18 }
 0x2da   : > { %3734 = vmatmul.mubr.msk.f32.gmra.mxu0 %vm801_vm7, %v3902_v30 }
 0x2db   : > { %v1831_v48 = vadd.f32 %v1805_v58, %v4602_v12 }
 0x2dc   : > { %v1721_v55 = vpop.xlane.xlu0 %1720 }
 0x2dd   : > { %v1808_v18 = vmul.f32 %v4766_v13, %v1721_v55  ;;  %v1864_v60 = vadd.f32 %v4772_v41, %v1831_v48 }
 0x2df   : > { %v1834_v58 = vadd.f32 %v1808_v18, %v4610_v17 }
 0x2e0   : > { %v3904_v8 = vpop.eup %3903  ;;  %v1718_v35 = vpop.xlane.xlu0 %1717 }
 0x2e1   : > { %v3906_v3 = vpop.eup %3905  ;;  %3736 = vmatprep.mubr.msk.f32.mxu0 %vm801_vm7, %v3904_v8  ;;  %v1807_v63 = vmul.f32 %v4766_v13, %v1718_v35 }
 0x2e2   : > { %3737 = vmatmul.mubr.msk.f32.gmra.mxu0 %vm801_vm7, %v3906_v3  ;;  %v1863_v3 = vadd.f32 %v4772_v41, %v1830_v56 }
 0x2e3   : > { %v1833_v15 = vadd.f32 %v1807_v63, %v4617_v22 }
 0x2e4   : > { %v1727_v20 = vpop.xlane.xlu0 %1726 }
 0x2e5   : > { %v1810_v6 = vmul.f32 %v4766_v13, %v1727_v20  ;;  %v1866_v55 = vadd.f32 %v4772_v41, %v1833_v15 }
 0x2e8   : > { %v1724_v19 = vpop.xlane.xlu0 %1723 }
 0x2e9   : > { %v1809_v12 = vmul.f32 %v4766_v13, %v1724_v19  ;;  %v1867_v19 = vadd.f32 %v4772_v41, %v1834_v58 }
 0x2eb   : > { %v1835_v46 = vadd.f32 %v1809_v12, %v4631_v36 }
 0x2ec   : > { %v1730_v53 = vpop.xlane.xlu0 %1729 }
 0x2ed   : > { %v1811_v22 = vmul.f32 %v4766_v13, %v1730_v53  ;;  %v1868_v17 = vadd.f32 %v4772_v41, %v1835_v46 }
 0x2ef   : > { %v1837_v20 = vadd.f32 %v1811_v22, %v4644_v52 }
 0x2f0   : > { %v1733_v50 = vpop.xlane.xlu0 %1732 }
 0x2f1   : > { %v1812_v48 = vmul.f32 %v4766_v13, %v1733_v50 }
 0x2f3   : > { %v1706_v45 = vpop.xlane.xlu1 %1705  ;;  %v1838_v53 = vadd.f32 %v1812_v48, %v4638_v43 }
 0x2f4   : > { %v1803_v30 = vmul.f32 %v4766_v13, %v1706_v45  ;;  %v1739_v40 = vpop.xlane.xlu0 %1738  ;;  %v1836_v45 = vadd.f32 %v1810_v6, %v4624_v27  ;;  %v1870_v27 = vadd.f32 %v4772_v41, %v1837_v20 }
 0x2f6   : > { %v1829_v8 = vadd.f32 %v1803_v30, %v4589_v1  ;;  %v1865_v1 = vadd.f32 %v4772_v41, %v1832_v2  ;;  %v1869_v36 = vadd.f32 %v4772_v41, %v1836_v45 }
 0x2f7   : > { %v1736_v31 = vpop.xlane.xlu1 %1735 }
 0x2f8   : > { %v1862_v35 = vadd.f32 %v4772_v41, %v1829_v8  ;;  %v1813_v63 = vmul.f32 %v4766_v13, %v1736_v31  ;;  %v1745_v30 = vpop.xlane.xlu0 %1744  ;;  %v1871_v31 = vadd.f32 %v4772_v41, %v1838_v53 }
 0x2f9   : > { %v1816_v15 = vmul.f32 %v4766_v13, %v1745_v30 }
 0x2fa   : > { %3907 = vtanh.f32 %v1862_v35  ;;  %v1839_v50 = vadd.f32 %v1813_v63, %v4659_v4 }
 0x2fb   : > { %3909 = vtanh.f32 %v1863_v3  ;;  %v1742_v56 = vpop.xlane.xlu1 %1741  ;;  %v1814_v3 = vmul.f32 %v4766_v13, %v1739_v40  ;;  %v1842_v58 = vadd.f32 %v1816_v15, %v4665_v14 }
 0x2fc   : > { %3911 = vtanh.f32 %v1864_v60  ;;  %v1815_v2 = vmul.f32 %v4766_v13, %v1742_v56  ;;  %v1751_v18 = vpop.xlane.xlu0 %1750  ;;  %v1872_v35 = vadd.f32 %v4772_v41, %v1839_v50 }
 0x2fd   : > { %3913 = vtanh.f32 %v1865_v1  ;;  %v1840_v60 = vadd.f32 %v1814_v3, %v4651_v61  ;;  %v1818_v6 = vmul.f32 %v4766_v13, %v1751_v18  ;;  %v1875_v14 = vadd.f32 %v4772_v41, %v1842_v58 }
 0x2fe   : > { %3915 = vtanh.f32 %v1866_v55  ;;  %v1841_v40 = vadd.f32 %v1815_v2, %v4672_v23 }
 0x2ff   : > { %v1748_v8 = vpop.xlane.xlu1 %1747  ;;  %3917 = vtanh.f32 %v1867_v19  ;;  %v1873_v61 = vadd.f32 %v4772_v41, %v1840_v60  ;;  %v1844_v48 = vadd.f32 %v1818_v6, %v4679_v32 }
 0x300   : > { %3919 = vtanh.f32 %v1868_v17  ;;  %v1817_v4 = vmul.f32 %v4766_v13, %v1748_v8  ;;  %v1874_v23 = vadd.f32 %v4772_v41, %v1841_v40  ;;  %v1757_v46 = vpop.xlane.xlu0 %1756 }
 0x301   : > { %3921 = vtanh.f32 %v1869_v36  ;;  %v1820_v17 = vmul.f32 %v4766_v13, %v1757_v46  ;;  %v1788_v36 = vadd.f32 %v4712_v37, %v4710_v28  ;;  %v1877_v32 = vadd.f32 %v4772_v41, %v1844_v48  ;;  %v4895_v46 = vld [vmem:[%s5318_s11] ss:$0 sm:$0xff] }
 0x302   : > { %3923 = vtanh.f32 %v1870_v27  ;;  %v1843_v55 = vadd.f32 %v1817_v4, %v4686_v47  ;;  %v2218_v4 = vld [vmem:[%s5319_s12] sm:$0xff] }
 0x303   : > { %v1754_v12 = vpop.xlane.xlu1 %1753  ;;  %3925 = vtanh.f32 %v1871_v31  ;;  %v1846_v53 = vadd.f32 %v1820_v17, %v4693_v62  ;;  %v2221_v31 = vld [vmem:[%s5319_s12 + $0x18] sm:$0xff] }
 0x304   : > { %3927 = vtanh.f32 %v1872_v35  ;;  %v1819_v22 = vmul.f32 %v4766_v13, %v1754_v12  ;;  %v1876_v47 = vadd.f32 %v4772_v41, %v1843_v55  ;;  %3769 = vmatprep.subr.mxu1 %v2221_v31  ;;  %v2220_v12 = vld [vmem:[%s5319_s12 + $0x10] sm:$0xff] }
 0x305   : > { %3929 = vtanh.f32 %v1873_v61  ;;  %v1879_v28 = vadd.f32 %v4772_v41, %v1846_v53  ;;  %3770 = vmatpush3.msra.mxu1 %v2221_v31 }
 0x306   : > { %3931 = vtanh.f32 %v1874_v23  ;;  %v1845_v63 = vadd.f32 %v1819_v22, %v4700_v10  ;;  %3771 = vmatprep.subr.mxu1 %v2220_v12 }
 0x307   : > { %v3908_v52 = vpop.eup %3907  ;;  %v1760_v45 = vpop.xlane.xlu1 %1759  ;;  %3933 = vtanh.f32 %v1875_v14  ;;  %3772 = vmatpush3.msra.mxu1 %v2220_v12 }
 0x308   : > { %v3910_v43 = vpop.eup %3909  ;;  %3739 = vmatprep.mubr.msk.f32.mxu0 %vm801_vm7, %v3908_v52  ;;  %v1821_v30 = vmul.f32 %v4766_v13, %v1760_v45  ;;  %3935 = vtanh.f32 %v1876_v47  ;;  %v1878_v27 = vadd.f32 %v4772_v41, %v1845_v63 }
 0x309   : > { %v3912_v1 = vpop.eup %3911  ;;  %3740 = vmatmul.mubr.msk.f32.gmra.mxu0 %vm801_vm7, %v3910_v43  ;;  %3937 = vtanh.f32 %v1877_v32  ;;  %v2219_v43 = vld [vmem:[%s5319_s12 + $0x8] sm:$0xff] }
 0x30a   : > { %3742 = vmatprep.mubr.msk.f32.mxu0 %vm801_vm7, %v3912_v1  ;;  %v3914_v56 = vpop.eup %3913  ;;  %v1847_v10 = vadd.f32 %v1821_v30, %v1788_v36  ;;  %3939 = vtanh.f32 %v1878_v27  ;;  %3773 = vmatprep.subr.mxu1 %v2219_v43 }
 0x30b   : > { %v3916_v19 = vpop.eup %3915  ;;  %3941 = vtanh.f32 %v1879_v28  ;;  %3774 = vmatpush3.msra.mxu1 %v2219_v43 }
 0x30c   : > { %v3918_v20 = vpop.eup %3917  ;;  %v1880_v2 = vadd.f32 %v4772_v41, %v1847_v10  ;;  %3775 = vmatprep.subr.mxu1 %v2218_v4 }
 0x30d   : > { %3743 = vmatmul.mubr.msk.f32.gmra.mxu0 %vm801_vm7, %v3914_v56  ;;  %v3920_v8 = vpop.eup %3919  ;;  %3776 = vmatpush3.msra.mxu1 %v2218_v4 }
 0x30e   : > { %3745 = vmatprep.mubr.msk.f32.mxu0 %vm801_vm7, %v3916_v19  ;;  %v3922_v3 = vpop.eup %3921  ;;  %3943 = vtanh.f32 %v1880_v2  ;;  %3816 = vmatprep.subr.mxu1 %v5360_v7 }
 0x30f   : > { %v3924_v50 = vpop.eup %3923 }
 0x310   : > { %v3926_v37 = vpop.eup %3925 }
 0x311   : > { %3746 = vmatmul.mubr.msk.f32.gmra.mxu0 %vm801_vm7, %v3918_v20  ;;  %v3928_v18 = vpop.eup %3927 }
 0x312   : > { %3748 = vmatprep.mubr.msk.f32.mxu0 %vm801_vm7, %v3920_v8  ;;  %v3930_v62 = vpop.eup %3929 }
 0x313   : > { %v3932_v52 = vpop.eup %3931 }
 0x314   : > { %v3934_v60 = vpop.eup %3933 }
 0x315   : > { %3749 = vmatmul.mubr.msk.f32.gmra.mxu0 %vm801_vm7, %v3922_v3  ;;  %v3936_v15 = vpop.eup %3935 }
 0x316   : > { %3751 = vmatprep.mubr.msk.f32.mxu0 %vm801_vm7, %v3924_v50  ;;  %v3938_v35 = vpop.eup %3937 }
 0x317   : > { %v3940_v40 = vpop.eup %3939 }
 0x318   : > { %v3942_v1 = vpop.eup %3941 }
 0x319   : > { %3752 = vmatmul.mubr.msk.f32.gmra.mxu0 %vm801_vm7, %v3926_v37 }
 0x31a   : > { %3754 = vmatprep.mubr.msk.f32.mxu0 %vm801_vm7, %v3928_v18 }
 0x31b   : > { %v3944_v61 = vpop.eup %3943 }
 0x31d   : > { %3755 = vmatmul.mubr.msk.f32.gmra.mxu0 %vm801_vm7, %v3930_v62 }
 0x31e   : > { %3757 = vmatprep.mubr.msk.f32.mxu0 %vm801_vm7, %v3932_v52 }
 0x321   : > { %3758 = vmatmul.mubr.msk.f32.gmra.mxu0 %vm801_vm7, %v3934_v60 }
 0x322   : > { %3760 = vmatprep.mubr.msk.f32.mxu0 %vm801_vm7, %v3936_v15 }
 0x325   : > { %3761 = vmatmul.mubr.msk.f32.gmra.mxu0 %vm801_vm7, %v3938_v35 }
 0x326   : > { %3763 = vmatprep.mubr.msk.f32.mxu0 %vm801_vm7, %v3940_v40 }
 0x329   : > { %3764 = vmatmul.mubr.msk.f32.gmra.mxu0 %vm801_vm7, %v3942_v1 }
 0x32a   : > { %3766 = vmatprep.mubr.msk.f32.mxu0 %vm801_vm7, %v3944_v61 }
 0x34d   : > { %v1763_v58 = vpop.xlane.xlu0 %1762 }
 0x34e   : > { %v1822_v6 = vmul.f32 %v4766_v13, %v1763_v58 }
 0x350   : > { %v1848_v56 = vadd.f32 %v1822_v6, %v4708_v25 }
 0x352   : > { %v1881_v23 = vadd.f32 %v4772_v41, %v1848_v56 }
 0x354   : > { %3945 = vtanh.f32 %v1881_v23 }
 0x361   : > { %v3946_v55 = vpop.eup %3945 }
 0x362   : > { %3767 = vmatmul.mubr.msk.f32.gmra.mxu0 %vm801_vm7, %v3946_v55 }
 0x394   : > { %v3732_v22 = vpop.f32.mrf.mxu0 }
 0x395   : > { %v2069_v19 = vadd.f32 %v3732_v22, %v4895_v46 }
 0x396   : > { %v2063_v45 = vpop.f32.mrf.mxu0 }
 0x397   : > { %3947 = vtanh.f32 %v2069_v19  ;;  %v2064_v13 = vadd.f32 %v4895_v46, %v2063_v45 }
 0x399   : > { %3949 = vtanh.f32 %v2064_v13 }
 0x39a   : > { %v3735_v25 = vpop.f32.mrf.mxu0 }
 0x39b   : > { %v2079_v41 = vadd.f32 %v3735_v25, %v4895_v46 }
 0x39c   : > { %v2073_v14 = vpop.f32.mrf.mxu0 }
 0x39d   : > { %3951 = vtanh.f32 %v2079_v41  ;;  %v2074_v48 = vadd.f32 %v4895_v46, %v2073_v14 }
 0x39f   : > { %3953 = vtanh.f32 %v2074_v48 }
 0x3a2   : > { %v3738_v17 = vpop.f32.mrf.mxu0 }
 0x3a3   : > { %v2089_v20 = vadd.f32 %v3738_v17, %v4895_v46 }
 0x3a4   : > { %v3948_v47 = vpop.eup %3947  ;;  %v2083_v63 = vpop.f32.mrf.mxu0 }
 0x3a5   : > { %2692 = vst.msk [vmem:[#allocation7 + $0x8] sm:$0xff] %vm801_vm7, %v3948_v47  ;;  %3955 = vtanh.f32 %v2089_v20  ;;  %v2084_v30 = vadd.f32 %v4895_v46, %v2083_v63 }
 0x3a6   : > { %v3950_v8 = vpop.eup %3949 }
 0x3a7   : > { %2691 = vst.msk [vmem:[#allocation7] sm:$0xff] %vm801_vm7, %v3950_v8  ;;  %3957 = vtanh.f32 %v2084_v30  ;;  %3777 = vmatprep.mubr.msk.f32.mxu1 %vm801_vm7, %v3950_v8 }
 0x3a8   : > { %3778 = vmatmul.mubr.msk.f32.vlgmr.msra.gmra.mxu1 %vm801_vm7, %v3948_v47 }
 0x3aa   : > { %v3952_v36 = vpop.eup %3951 }
 0x3ab   : > { %2694 = vst.msk [vmem:[#allocation7 + $0x18] sm:$0xff] %vm801_vm7, %v3952_v36 }
 0x3ac   : > { %v3954_v32 = vpop.eup %3953 }
 0x3ad   : > { %2693 = vst.msk [vmem:[#allocation7 + $0x10] sm:$0xff] %vm801_vm7, %v3954_v32  ;;  %3780 = vmatprep.mubr.msk.f32.mxu1 %vm801_vm7, %v3954_v32 }
 0x3ae   : > { %3781 = vmatmul.mubr.msk.f32.gmra.mxu1 %vm801_vm7, %v3952_v36 }
 0x3b2   : > { %v3956_v53 = vpop.eup %3955 }
 0x3b3   : > { %2696 = vst.msk [vmem:[#allocation7 + $0x28] sm:$0xff] %vm801_vm7, %v3956_v53 }
 0x3b4   : > { %v3958_v3 = vpop.eup %3957 }
 0x3b5   : > { %2695 = vst.msk [vmem:[#allocation7 + $0x20] sm:$0xff] %vm801_vm7, %v3958_v3  ;;  %3783 = vmatprep.mubr.msk.f32.mxu1 %vm801_vm7, %v3958_v3 }
 0x3b6   : > { %3784 = vmatmul.mubr.msk.f32.gmra.mxu1 %vm801_vm7, %v3956_v53 }
 0x3c9   : > { %v3741_v27 = vpop.f32.mrf.mxu0 }
 0x3ca   : > { %v2099_v10 = vadd.f32 %v3741_v27, %v4895_v46 }
 0x3cb   : > { %v2093_v50 = vpop.f32.mrf.mxu0 }
 0x3cc   : > { %3959 = vtanh.f32 %v2099_v10  ;;  %v2094_v28 = vadd.f32 %v4895_v46, %v2093_v50 }
 0x3cd   : > { %v3744_v37 = vpop.f32.mrf.mxu0 }
 0x3ce   : > { %3961 = vtanh.f32 %v2094_v28  ;;  %v2109_v2 = vadd.f32 %v3744_v37, %v4895_v46 }
 0x3cf   : > { %v2103_v18 = vpop.f32.mrf.mxu0 }
 0x3d0   : > { %3963 = vtanh.f32 %v2109_v2  ;;  %v2104_v62 = vadd.f32 %v4895_v46, %v2103_v18 }
 0x3d1   : > { %v3747_v52 = vpop.f32.mrf.mxu0 }
 0x3d2   : > { %3965 = vtanh.f32 %v2104_v62  ;;  %v2119_v31 = vadd.f32 %v3747_v52, %v4895_v46 }
 0x3d3   : > { %v2113_v60 = vpop.f32.mrf.mxu0 }
 0x3d4   : > { %3967 = vtanh.f32 %v2119_v31  ;;  %v2114_v15 = vadd.f32 %v4895_v46, %v2113_v60 }
 0x3d5   : > { %v3750_v12 = vpop.f32.mrf.mxu0 }
 0x3d6   : > { %3969 = vtanh.f32 %v2114_v15  ;;  %v2129_v43 = vadd.f32 %v3750_v12, %v4895_v46 }
 0x3d7   : > { %v2123_v35 = vpop.f32.mrf.mxu0 }
 0x3d8   : > { %3971 = vtanh.f32 %v2129_v43  ;;  %v2124_v40 = vadd.f32 %v4895_v46, %v2123_v35 }
 0x3d9   : > { %v3960_v4 = vpop.eup %3959  ;;  %v3753_v1 = vpop.f32.mrf.mxu0 }
 0x3da   : > { %2698 = vst.msk [vmem:[#allocation7 + $0x38] sm:$0xff] %vm801_vm7, %v3960_v4  ;;  %3973 = vtanh.f32 %v2124_v40  ;;  %v2139_v61 = vadd.f32 %v3753_v1, %v4895_v46 }
 0x3db   : > { %v3962_v58 = vpop.eup %3961  ;;  %v2133_v6 = vpop.f32.mrf.mxu0 }
 0x3dc   : > { %2697 = vst.msk [vmem:[#allocation7 + $0x30] sm:$0xff] %vm801_vm7, %v3962_v58  ;;  %3975 = vtanh.f32 %v2139_v61  ;;  %v2134_v56 = vadd.f32 %v4895_v46, %v2133_v6  ;;  %3786 = vmatprep.mubr.msk.f32.mxu1 %vm801_vm7, %v3962_v58 }
 0x3dd   : > { %v3964_v23 = vpop.eup %3963  ;;  %v3756_v55 = vpop.f32.mrf.mxu0  ;;  %3787 = vmatmul.mubr.msk.f32.gmra.mxu1 %vm801_vm7, %v3960_v4 }
 0x3de   : > { %2700 = vst.msk [vmem:[#allocation7 + $0x48] sm:$0xff] %vm801_vm7, %v3964_v23  ;;  %3977 = vtanh.f32 %v2134_v56  ;;  %v2149_v22 = vadd.f32 %v3756_v55, %v4895_v46 }
 0x3df   : > { %v3966_v19 = vpop.eup %3965  ;;  %v2143_v45 = vpop.f32.mrf.mxu0 }
 0x3e0   : > { %2699 = vst.msk [vmem:[#allocation7 + $0x40] sm:$0xff] %vm801_vm7, %v3966_v19  ;;  %3979 = vtanh.f32 %v2149_v22  ;;  %v2144_v13 = vadd.f32 %v4895_v46, %v2143_v45  ;;  %3789 = vmatprep.mubr.msk.f32.mxu1 %vm801_vm7, %v3966_v19 }
 0x3e1   : > { %v3968_v25 = vpop.eup %3967  ;;  %v3759_v41 = vpop.f32.mrf.mxu0  ;;  %3790 = vmatmul.mubr.msk.f32.gmra.mxu1 %vm801_vm7, %v3964_v23 }
 0x3e2   : > { %2702 = vst.msk [vmem:[#allocation7 + $0x58] sm:$0xff] %vm801_vm7, %v3968_v25  ;;  %3981 = vtanh.f32 %v2144_v13  ;;  %v2159_v14 = vadd.f32 %v3759_v41, %v4895_v46 }
 0x3e3   : > { %v3970_v48 = vpop.eup %3969  ;;  %v2153_v17 = vpop.f32.mrf.mxu0 }
 0x3e4   : > { %2701 = vst.msk [vmem:[#allocation7 + $0x50] sm:$0xff] %vm801_vm7, %v3970_v48  ;;  %3983 = vtanh.f32 %v2159_v14  ;;  %v2154_v20 = vadd.f32 %v4895_v46, %v2153_v17  ;;  %3792 = vmatprep.mubr.msk.f32.mxu1 %vm801_vm7, %v3970_v48  ;;  %v4982_v14 = vld [vmem:[%s5320_s13] ss:$0 sm:$0xff] }
 0x3e5   : > { %v3972_v47 = vpop.eup %3971  ;;  %v3762_v63 = vpop.f32.mrf.mxu0  ;;  %3793 = vmatmul.mubr.msk.f32.gmra.mxu1 %vm801_vm7, %v3968_v25 }
 0x3e6   : > { %2704 = vst.msk [vmem:[#allocation7 + $0x68] sm:$0xff] %vm801_vm7, %v3972_v47  ;;  %3985 = vtanh.f32 %v2154_v20  ;;  %v2169_v30 = vadd.f32 %v3762_v63, %v4895_v46 }
 0x3e7   : > { %v3974_v8 = vpop.eup %3973  ;;  %v2163_v36 = vpop.f32.mrf.mxu0 }
 0x3e8   : > { %2703 = vst.msk [vmem:[#allocation7 + $0x60] sm:$0xff] %vm801_vm7, %v3974_v8  ;;  %3987 = vtanh.f32 %v2169_v30  ;;  %v2164_v32 = vadd.f32 %v4895_v46, %v2163_v36  ;;  %3795 = vmatprep.mubr.msk.f32.mxu1 %vm801_vm7, %v3974_v8 }
 0x3e9   : > { %v3976_v53 = vpop.eup %3975  ;;  %v3765_v3 = vpop.f32.mrf.mxu0  ;;  %3796 = vmatmul.mubr.msk.f32.gmra.mxu1 %vm801_vm7, %v3972_v47 }
 0x3ea   : > { %2706 = vst.msk [vmem:[#allocation7 + $0x78] sm:$0xff] %vm801_vm7, %v3976_v53  ;;  %3989 = vtanh.f32 %v2164_v32  ;;  %v2179_v27 = vadd.f32 %v3765_v3, %v4895_v46 }
 0x3eb   : > { %v3978_v10 = vpop.eup %3977  ;;  %v2173_v50 = vpop.f32.mrf.mxu0 }
 0x3ec   : > { %2705 = vst.msk [vmem:[#allocation7 + $0x70] sm:$0xff] %vm801_vm7, %v3978_v10  ;;  %3991 = vtanh.f32 %v2179_v27  ;;  %v2174_v28 = vadd.f32 %v4895_v46, %v2173_v50  ;;  %3798 = vmatprep.mubr.msk.f32.mxu1 %vm801_vm7, %v3978_v10 }
 0x3ed   : > { %v3980_v37 = vpop.eup %3979  ;;  %3799 = vmatmul.mubr.msk.f32.gmra.mxu1 %vm801_vm7, %v3976_v53 }
 0x3ee   : > { %2708 = vst.msk [vmem:[#allocation7 + $0x88] sm:$0xff] %vm801_vm7, %v3980_v37  ;;  %3993 = vtanh.f32 %v2174_v28 }
 0x3ef   : > { %v3982_v2 = vpop.eup %3981 }
 0x3f0   : > { %2707 = vst.msk [vmem:[#allocation7 + $0x80] sm:$0xff] %vm801_vm7, %v3982_v2  ;;  %3801 = vmatprep.mubr.msk.f32.mxu1 %vm801_vm7, %v3982_v2  ;;  %v4998_v2 = vld [vmem:[%s5321_s14] ss:$0 sm:$0xff] }
 0x3f1   : > { %v3984_v18 = vpop.eup %3983  ;;  %3802 = vmatmul.mubr.msk.f32.gmra.mxu1 %vm801_vm7, %v3980_v37 }
 0x3f2   : > { %2710 = vst.msk [vmem:[#allocation7 + $0x98] sm:$0xff] %vm801_vm7, %v3984_v18 }
 0x3f3   : > { %v3986_v62 = vpop.eup %3985 }
 0x3f4   : > { %2709 = vst.msk [vmem:[#allocation7 + $0x90] sm:$0xff] %vm801_vm7, %v3986_v62  ;;  %3804 = vmatprep.mubr.msk.f32.mxu1 %vm801_vm7, %v3986_v62 }
 0x3f5   : > { %v3988_v52 = vpop.eup %3987  ;;  %3805 = vmatmul.mubr.msk.f32.gmra.mxu1 %vm801_vm7, %v3984_v18 }
 0x3f6   : > { %2712 = vst.msk [vmem:[#allocation7 + $0xa8] sm:$0xff] %vm801_vm7, %v3988_v52 }
 0x3f7   : > { %v3990_v31 = vpop.eup %3989 }
 0x3f8   : > { %2711 = vst.msk [vmem:[#allocation7 + $0xa0] sm:$0xff] %vm801_vm7, %v3990_v31  ;;  %3807 = vmatprep.mubr.msk.f32.mxu1 %vm801_vm7, %v3990_v31 }
 0x3f9   : > { %v3992_v60 = vpop.eup %3991  ;;  %3808 = vmatmul.mubr.msk.f32.gmra.mxu1 %vm801_vm7, %v3988_v52 }
 0x3fa   : > { %2714 = vst.msk [vmem:[#allocation7 + $0xb8] sm:$0xff] %vm801_vm7, %v3992_v60 }
 0x3fb   : > { %v3994_v15 = vpop.eup %3993 }
 0x3fc   : > { %2713 = vst.msk [vmem:[#allocation7 + $0xb0] sm:$0xff] %vm801_vm7, %v3994_v15  ;;  %3810 = vmatprep.mubr.msk.f32.mxu1 %vm801_vm7, %v3994_v15 }
 0x3fd   : > { %3811 = vmatmul.mubr.msk.f32.gmra.mxu1 %vm801_vm7, %v3992_v60 }
 0x422   : > { %v3768_v12 = vpop.f32.mrf.mxu0 }
 0x423   : > { %v2189_v43 = vadd.f32 %v3768_v12, %v4895_v46 }
 0x424   : > { %v2183_v35 = vpop.f32.mrf.mxu0 }
 0x425   : > { %3995 = vtanh.f32 %v2189_v43  ;;  %v2184_v40 = vadd.f32 %v4895_v46, %v2183_v35 }
 0x427   : > { %3997 = vtanh.f32 %v2184_v40 }
 0x432   : > { %v3996_v4 = vpop.eup %3995 }
 0x433   : > { %2716 = vst.msk [vmem:[#allocation7 + $0xc8] sm:$0xff] %vm801_vm7, %v3996_v4 }
 0x434   : > { %v3998_v1 = vpop.eup %3997 }
 0x435   : > { %2715 = vst.msk [vmem:[#allocation7 + $0xc0] sm:$0xff] %vm801_vm7, %v3998_v1  ;;  %3813 = vmatprep.mubr.msk.f32.mxu1 %vm801_vm7, %v3998_v1 }
 0x436   : > { %3814 = vmatmul.mubr.msk.f32.gmra.mxu1 %vm801_vm7, %v3996_v4 }
 0x437   : > { %3824 = vmatprep.mubr.msk.f32.mxu1 %vm4140_vm5, %v5360_v7 }
 0x468   : > { %v3779_v61 = vpop.f32.mrf.mxu1 }
 0x46a   : > { %v4977_v58 = vpop.f32.mrf.mxu1 }
 0x46e   : > { %v3782_v6 = vpop.f32.mrf.mxu1 }
 0x46f   : > { %v2389_v60 = vadd.f32 %v3782_v6, %v4982_v14  ;;  %v2379_v6 = vadd.f32 %v3779_v61, %v4982_v14 }
 0x470   : > { %v2383_v56 = vpop.f32.mrf.mxu1 }
 0x471   : > { %v2384_v40 = vadd.f32 %v4982_v14, %v2383_v56 }
 0x476   : > { %v3785_v46 = vpop.f32.mrf.mxu1 }
 0x477   : > { %v2399_v28 = vadd.f32 %v3785_v46, %v4982_v14 }
 0x478   : > { %v2393_v23 = vpop.f32.mrf.mxu1 }
 0x479   : > { %v2394_v62 = vadd.f32 %v4982_v14, %v2393_v23 }
 0x49d   : > { %v3788_v55 = vpop.f32.mrf.mxu1 }
 0x49e   : > { %v2409_v27 = vadd.f32 %v3788_v55, %v4982_v14 }
 0x49f   : > { %v2403_v22 = vpop.f32.mrf.mxu1 }
 0x4a0   : > { %v2404_v10 = vadd.f32 %v4982_v14, %v2403_v22 }
 0x4a1   : > { %v3791_v19 = vpop.f32.mrf.mxu1 }
 0x4a2   : > { %v2419_v53 = vadd.f32 %v3791_v19, %v4982_v14  ;;  %v2374_v19 = vadd.f32 %v4982_v14, %v4977_v58 }
 0x4a3   : > { %v2413_v45 = vpop.f32.mrf.mxu1 }
 0x4a4   : > { %v2414_v3 = vadd.f32 %v4982_v14, %v2413_v45 }
 0x4a5   : > { %v3794_v13 = vpop.f32.mrf.mxu1 }
 0x4a6   : > { %v2429_v8 = vadd.f32 %v3794_v13, %v4982_v14 }
 0x4a7   : > { %v2423_v25 = vpop.f32.mrf.mxu1 }
 0x4a8   : > { %v2424_v32 = vadd.f32 %v4982_v14, %v2423_v25 }
 0x4a9   : > { %v3797_v41 = vpop.f32.mrf.mxu1 }
 0x4aa   : > { %v2439_v48 = vadd.f32 %v3797_v41, %v4982_v14 }
 0x4ab   : > { %v2433_v17 = vpop.f32.mrf.mxu1 }
 0x4ac   : > { %v2434_v20 = vadd.f32 %v4982_v14, %v2433_v17  ;;  %3999 = vtanh.f32 %v2439_v48 }
 0x4ad   : > { %v3800_v47 = vpop.f32.mrf.mxu1 }
 0x4ae   : > { %v2449_v63 = vadd.f32 %v3800_v47, %v4982_v14 }
 0x4af   : > { %v2443_v30 = vpop.f32.mrf.mxu1 }
 0x4b0   : > { %4001 = vtanh.f32 %v2449_v63  ;;  %v2444_v36 = vadd.f32 %v4982_v14, %v2443_v30 }
 0x4b1   : > { %4003 = vtanh.f32 %v2434_v20 }
 0x4b2   : > { %4005 = vtanh.f32 %v2444_v36 }
 0x4b3   : > { %4007 = vtanh.f32 %v2429_v8 }
 0x4b4   : > { %4009 = vtanh.f32 %v2424_v32 }
 0x4b5   : > { %4011 = vtanh.f32 %v2419_v53 }
 0x4b6   : > { %4013 = vtanh.f32 %v2414_v3 }
 0x4b7   : > { %4015 = vtanh.f32 %v2409_v27 }
 0x4b8   : > { %4017 = vtanh.f32 %v2404_v10 }
 0x4b9   : > { %v4000_v50 = vpop.eup %3999  ;;  %4019 = vtanh.f32 %v2399_v28 }
 0x4ba   : > { %v2548_v43 = vmul.f32 %v4000_v50, %v4998_v2  ;;  %4021 = vtanh.f32 %v2394_v62 }
 0x4bb   : > { %4023 = vtanh.f32 %v2389_v60  ;;  %v3803_v60 = vpop.f32.mrf.mxu1 }
 0x4bc   : > { %v2600_v23 = vsel %vm801_vm7, %v2548_v43, 0.0  ;;  %4025 = vtanh.f32 %v2384_v40 }
 0x4bd   : > { %v4002_v37 = vpop.eup %4001  ;;  %4027 = vtanh.f32 %v2379_v6  ;;  %v2453_v40 = vpop.f32.mrf.mxu1 }
 0x4be   : > { %v4004_v18 = vpop.eup %4003  ;;  %v2550_v52 = vmul.f32 %v4002_v37, %v4998_v2  ;;  %4029 = vtanh.f32 %v2374_v19 }
 0x4bf   : > { %v4006_v31 = vpop.eup %4005  ;;  %v2547_v1 = vmul.f32 %v4004_v18, %v4998_v2 }
 0x4c0   : > { %v2606_v15 = vsel %vm801_vm7, %v2550_v52, 0.0  ;;  %v2549_v12 = vmul.f32 %v4006_v31, %v4998_v2  ;;  %v4008_v35 = vpop.eup %4007 }
 0x4c1   : > { %2607 = vadd.xlane.f32.xlu1 %v2606_v15  ;;  %v4010_v46 = vpop.eup %4009  ;;  %v2546_v55 = vmul.f32 %v4008_v35, %v4998_v2  ;;  %v2597_v56 = vsel %vm801_vm7, %v2547_v1, 0.0 }
 0x4c2   : > { %v2603_v4 = vsel %vm801_vm7, %v2549_v12, 0.0  ;;  %v4012_v22 = vpop.eup %4011  ;;  %v2545_v45 = vmul.f32 %v4010_v46, %v4998_v2  ;;  %v3806_v46 = vpop.f32.mrf.mxu1 }
 0x4c3   : > { %2604 = vadd.xlane.f32.xlu0 %v2603_v4  ;;  %v4014_v13 = vpop.eup %4013  ;;  %v2594_v61 = vsel %vm801_vm7, %v2546_v55, 0.0  ;;  %v2544_v25 = vmul.f32 %v4012_v22, %v4998_v2 }
 0x4c4   : > { %v4016_v41 = vpop.eup %4015  ;;  %v2591_v48 = vsel %vm801_vm7, %v2545_v45, 0.0  ;;  %v2543_v17 = vmul.f32 %v4014_v13, %v4998_v2  ;;  %v2463_v6 = vpop.f32.mrf.mxu1 }
 0x4c5   : > { %2601 = vadd.xlane.f32.xlu1 %v2600_v23  ;;  %v4018_v58 = vpop.eup %4017  ;;  %v2588_v20 = vsel %vm801_vm7, %v2544_v25, 0.0  ;;  %v2542_v47 = vmul.f32 %v4016_v41, %v4998_v2 }
 0x4c6   : > { %v4020_v63 = vpop.eup %4019  ;;  %v2585_v30 = vsel %vm801_vm7, %v2543_v17, 0.0  ;;  %v2541_v8 = vmul.f32 %v4018_v58, %v4998_v2  ;;  %v3809_v23 = vpop.f32.mrf.mxu1  ;;  %v2469_v58 = vadd.f32 %v3806_v46, %v4982_v14 }
 0x4c7   : > { %2598 = vadd.xlane.f32.xlu0 %v2597_v56  ;;  %v4022_v36 = vpop.eup %4021  ;;  %v2582_v32 = vsel %vm801_vm7, %v2542_v47, 0.0  ;;  %v2540_v53 = vmul.f32 %v4020_v63, %v4998_v2  ;;  %v2479_v41 = vadd.f32 %v3809_v23, %v4982_v14  ;;  %v2459_v47 = vadd.f32 %v3803_v60, %v4982_v14 }
 0x4c8   : > { %v4024_v3 = vpop.eup %4023  ;;  %v2579_v27 = vsel %vm801_vm7, %v2541_v8, 0.0  ;;  %v2539_v10 = vmul.f32 %v4022_v36, %v4998_v2  ;;  %v2473_v55 = vpop.f32.mrf.mxu1  ;;  %v2454_v63 = vadd.f32 %v4982_v14, %v2453_v40 }
 0x4c9   : > { %2595 = vadd.xlane.f32.xlu1 %v2594_v61  ;;  %v4026_v50 = vpop.eup %4025  ;;  %v2576_v28 = vsel %vm801_vm7, %v2540_v53, 0.0  ;;  %v2538_v37 = vmul.f32 %v4024_v3, %v4998_v2  ;;  %v2474_v17 = vadd.f32 %v4982_v14, %v2473_v55 }
 0x4ca   : > { %v4028_v18 = vpop.eup %4027  ;;  %v2573_v62 = vsel %vm801_vm7, %v2539_v10, 0.0  ;;  %v2537_v52 = vmul.f32 %v4026_v50, %v4998_v2  ;;  %v3812_v22 = vpop.f32.mrf.mxu1 }
 0x4cb   : > { %2592 = vadd.xlane.f32.xlu0 %v2591_v48  ;;  %v4030_v31 = vpop.eup %4029  ;;  %v2570_v15 = vsel %vm801_vm7, %v2538_v37, 0.0  ;;  %v2536_v12 = vmul.f32 %v4028_v18, %v4998_v2  ;;  %v2489_v56 = vadd.f32 %v3812_v22, %v4982_v14 }
 0x4cc   : > { %v2567_v43 = vsel %vm801_vm7, %v2537_v52, 0.0  ;;  %v2535_v35 = vmul.f32 %v4030_v31, %v4998_v2  ;;  %v2483_v19 = vpop.f32.mrf.mxu1 }
 0x4cd   : > { %2589 = vadd.xlane.f32.xlu1 %v2588_v20  ;;  %v2564_v4 = vsel %vm801_vm7, %v2536_v12, 0.0  ;;  %v2484_v45 = vadd.f32 %v4982_v14, %v2483_v19  ;;  %4031 = vtanh.f32 %v2489_v56  ;;  %v2464_v20 = vadd.f32 %v4982_v14, %v2463_v6  ;;  %v964_v56 = vld [vmem:[%s5361_s28 + $0x8] sm:$0xff] }
 0x4ce   : > { %v2561_v1 = vsel %vm801_vm7, %v2535_v35, 0.0  ;;  %3440 = vmatprep.mubr.msk.f32.mxu0 %vm2772_vm13, %v964_v56 }
 0x4cf   : > { %2586 = vadd.xlane.f32.xlu0 %v2585_v30 }
 0x4d1   : > { %2583 = vadd.xlane.f32.xlu1 %v2582_v32 }
 0x4d3   : > { %2580 = vadd.xlane.f32.xlu0 %v2579_v27 }
 0x4d5   : > { %2577 = vadd.xlane.f32.xlu1 %v2576_v28 }
 0x4d7   : > { %2574 = vadd.xlane.f32.xlu0 %v2573_v62 }
 0x4d9   : > { %2571 = vadd.xlane.f32.xlu1 %v2570_v15 }
 0x4da   : > { %v4032_v30 = vpop.eup %4031 }
 0x4db   : > { %2568 = vadd.xlane.f32.xlu0 %v2567_v43  ;;  %v2558_v10 = vmul.f32 %v4032_v30, %v4998_v2 }
 0x4dd   : > { %2565 = vadd.xlane.f32.xlu1 %v2564_v4  ;;  %v2630_v18 = vsel %vm801_vm7, %v2558_v10, 0.0 }
 0x4df   : > { %2562 = vadd.xlane.f32.xlu0 %v2561_v1 }
 0x4f6   : > { %v3815_v13 = vpop.f32.mrf.mxu1 }
 0x4f7   : > { %v2499_v61 = vadd.f32 %v3815_v13, %v4982_v14  ;;  %v4143_v13 = vmov 0  }
 0x4f8   : > { %v2493_v25 = vpop.f32.mrf.mxu1  ;;  %3893 = vset.pattern.permute.xlu1 %v4143_v13  ;;  %3894 = vset.pattern.permute.xlu0 %v4143_v13 }
 0x4f9   : > { %4033 = vtanh.f32 %v2499_v61  ;;  %v2494_v48 = vadd.f32 %v4982_v14, %v2493_v25  ;;  %v2917_v61 = vld [vmem:[%s5323_s16 + $0x18] sm:$0xff]  ;;  %v2916_v25 = vld [vmem:[%s5323_s16 + $0x10] sm:$0xff] }
 0x4fa   : > { %4035 = vtanh.f32 %v2484_v45  ;;  %v2876_v45 = vld [vmem:[%s5312_s5] sm:$0xff]  ;;  %3817 = vmatpush3.msra.mxu1 %v2917_v61 }
 0x4fb   : > { %4037 = vtanh.f32 %v2494_v48  ;;  %v2878_v48 = vld [vmem:[%s5312_s5 + $0x10] sm:$0xf]  ;;  %3818 = vmatprep.subr.mxu1 %v5360_v7 }
 0x4fc   : > { %4039 = vtanh.f32 %v2479_v41  ;;  %3819 = vmatpush3.msra.mxu1 %v2916_v25 }
 0x4fd   : > { %4041 = vtanh.f32 %v2474_v17  ;;  %v2915_v17 = vld [vmem:[%s5323_s16 + $0x8] sm:$0xff]  ;;  %3820 = vmatprep.subr.mxu1 %v5360_v7 }
 0x4fe   : > { %4043 = vtanh.f32 %v2469_v58  ;;  %3821 = vmatpush3.msra.mxu1 %v2915_v17 }
 0x4ff   : > { %4045 = vtanh.f32 %v2464_v20  ;;  %3822 = vmatprep.subr.mxu1 %v5360_v7 }
 0x500   : > { %4047 = vtanh.f32 %v2459_v47 }
 0x501   : > { %4049 = vtanh.f32 %v2454_v63 }
 0x506   : > { %v4034_v8 = vpop.eup %4033 }
 0x507   : > { %v4036_v36 = vpop.eup %4035  ;;  %v2560_v32 = vmul.f32 %v4034_v8, %v4998_v2 }
 0x508   : > { %v4038_v53 = vpop.eup %4037  ;;  %v2557_v14 = vmul.f32 %v4036_v36, %v4998_v2 }
 0x509   : > { %v2636_v3 = vsel %vm801_vm7, %v2560_v32, 0.0  ;;  %v2559_v27 = vmul.f32 %v4038_v53, %v4998_v2  ;;  %v4040_v50 = vpop.eup %4039 }
 0x50a   : > { %2637 = vadd.xlane.f32.xlu1 %v2636_v3  ;;  %v4042_v37 = vpop.eup %4041  ;;  %v2556_v62 = vmul.f32 %v4040_v50, %v4998_v2  ;;  %v2627_v31 = vsel %vm801_vm7, %v2557_v14, 0.0 }
 0x50b   : > { %v2633_v28 = vsel %vm801_vm7, %v2559_v27, 0.0  ;;  %v4044_v52 = vpop.eup %4043  ;;  %v2555_v60 = vmul.f32 %v4042_v37, %v4998_v2 }
 0x50c   : > { %2634 = vadd.xlane.f32.xlu0 %v2633_v28  ;;  %v4046_v15 = vpop.eup %4045  ;;  %v2624_v12 = vsel %vm801_vm7, %v2556_v62, 0.0  ;;  %v2554_v43 = vmul.f32 %v4044_v52, %v4998_v2 }
 0x50d   : > { %v4048_v35 = vpop.eup %4047  ;;  %v2621_v40 = vsel %vm801_vm7, %v2555_v60, 0.0  ;;  %v2553_v4 = vmul.f32 %v4046_v15, %v4998_v2 }
 0x50e   : > { %2631 = vadd.xlane.f32.xlu1 %v2630_v18  ;;  %v4050_v1 = vpop.eup %4049  ;;  %v2618_v46 = vsel %vm801_vm7, %v2554_v43, 0.0  ;;  %v2552_v6 = vmul.f32 %v4048_v35, %v4998_v2 }
 0x50f   : > { %v2615_v23 = vsel %vm801_vm7, %v2553_v4, 0.0  ;;  %v2551_v55 = vmul.f32 %v4050_v1, %v4998_v2  ;;  %v2877_v2 = vld [vmem:[%s5312_s5 + $0x8] sm:$0xff] }
 0x510   : > { %2628 = vadd.xlane.f32.xlu0 %v2627_v31  ;;  %v2612_v22 = vsel %vm801_vm7, %v2552_v6, 0.0 }
 0x511   : > { %v2609_v19 = vsel %vm801_vm7, %v2551_v55, 0.0 }
 0x512   : > { %2625 = vadd.xlane.f32.xlu1 %v2624_v12 }
 0x514   : > { %2622 = vadd.xlane.f32.xlu0 %v2621_v40 }
 0x516   : > { %2619 = vadd.xlane.f32.xlu1 %v2618_v46 }
 0x518   : > { %2616 = vadd.xlane.f32.xlu0 %v2615_v23 }
 0x51a   : > { %2613 = vadd.xlane.f32.xlu1 %v2612_v22 }
 0x51c   : > { %2610 = vadd.xlane.f32.xlu0 %v2609_v19 }
 0x52b   : > { %2881 = vperm.xlu1 %3893, %v2876_v45  }
 0x52f   : > { %2891 = vperm.xlu1 %3893, %v2878_v48  }
 0x532   : > { %2886 = vperm.xlu0 %3894, %v2877_v2  }
 0x54a   : > { %v2608_v41 = vpop.xlane.xlu1 %2607 }
 0x54b   : > { %4051 = vtanh.f32 %v2608_v41 }
 0x54c   : > { %v2605_v58 = vpop.xlane.xlu0 %2604 }
 0x54d   : > { %4053 = vtanh.f32 %v2605_v58 }
 0x54e   : > { %v2602_v20 = vpop.xlane.xlu1 %2601 }
 0x54f   : > { %4055 = vtanh.f32 %v2602_v20 }
 0x550   : > { %v2599_v47 = vpop.xlane.xlu0 %2598 }
 0x551   : > { %4057 = vtanh.f32 %v2599_v47 }
 0x552   : > { %v2596_v63 = vpop.xlane.xlu1 %2595 }
 0x553   : > { %4059 = vtanh.f32 %v2596_v63 }
 0x554   : > { %v2593_v30 = vpop.xlane.xlu0 %2592 }
 0x555   : > { %4061 = vtanh.f32 %v2593_v30 }
 0x556   : > { %v2590_v8 = vpop.xlane.xlu1 %2589 }
 0x557   : > { %4063 = vtanh.f32 %v2590_v8 }
 0x558   : > { %v4052_v36 = vpop.eup %4051  ;;  %v2587_v32 = vpop.xlane.xlu0 %2586 }
 0x559   : > { %v2680_v53 = vmul.f32 %v4052_v36, %v4636_v42  ;;  %4065 = vtanh.f32 %v2587_v32 }
 0x55a   : > { %v4054_v3 = vpop.eup %4053  ;;  %v2584_v27 = vpop.xlane.xlu1 %2583 }
 0x55b   : > { %2732 = vst.msk [vmem:[#allocation7 + $0x78] sm:$0xff] %vm818_vm8, %v2680_v53  ;;  %v2679_v10 = vmul.f32 %v4054_v3, %v4642_v51  ;;  %4067 = vtanh.f32 %v2584_v27 }
 0x55c   : > { %v4056_v50 = vpop.eup %4055  ;;  %v2581_v28 = vpop.xlane.xlu0 %2580 }
 0x55d   : > { %2731 = vst.msk [vmem:[#allocation7 + $0x70] sm:$0xff] %vm818_vm8, %v2679_v10  ;;  %v2678_v14 = vmul.f32 %v4056_v50, %v4622_v26  ;;  %4069 = vtanh.f32 %v2581_v28 }
 0x55e   : > { %v4058_v37 = vpop.eup %4057  ;;  %v2578_v18 = vpop.xlane.xlu1 %2577 }
 0x55f   : > { %2730 = vst.msk [vmem:[#allocation7 + $0x68] sm:$0xff] %vm818_vm8, %v2678_v14  ;;  %v2677_v42 = vmul.f32 %v4058_v37, %v4629_v33  ;;  %4071 = vtanh.f32 %v2578_v18 }
 0x560   : > { %v4060_v62 = vpop.eup %4059  ;;  %v2575_v52 = vpop.xlane.xlu0 %2574 }
 0x561   : > { %2729 = vst.msk [vmem:[#allocation7 + $0x60] sm:$0xff] %vm818_vm8, %v2677_v42  ;;  %v2676_v51 = vmul.f32 %v4060_v62, %v4608_v16  ;;  %4073 = vtanh.f32 %v2575_v52 }
 0x562   : > { %v4062_v31 = vpop.eup %4061  ;;  %v2572_v60 = vpop.xlane.xlu1 %2571  ;;  %v2761_v15 = vld [vmem:[#allocation7 + $0x78] sm:$0xff] }
 0x563   : > { %2728 = vst.msk [vmem:[#allocation7 + $0x58] sm:$0xff] %vm818_vm8, %v2676_v51  ;;  %v2675_v26 = vmul.f32 %v4062_v31, %v4615_v21  ;;  %4075 = vtanh.f32 %v2572_v60  ;;  %2783 = vmatpush1.msra.mxu0 %v2761_v15  ;;  %v5362_v60 = vld [vmem:[#allocation12_spill] sm:$0xff] }
 0x564   : > { %v4064_v12 = vpop.eup %4063  ;;  %2784 = vmatprep.subr.mxu0 %v5360_v7  ;;  %v2569_v33 = vpop.xlane.xlu0 %2568  ;;  %v2760_v43 = vld [vmem:[#allocation7 + $0x70] sm:$0xff] }
 0x565   : > { %2727 = vst.msk [vmem:[#allocation7 + $0x50] sm:$0xff] %vm818_vm8, %v2675_v26  ;;  %v2674_v35 = vmul.f32 %v4064_v12, %v4593_v5  ;;  %4077 = vtanh.f32 %v2569_v33  ;;  %2785 = vmatpush1.msra.mxu0 %v2760_v43  ;;  %v5363_v12 = vld [vmem:[#allocation13_spill] sm:$0xff] }
 0x566   : > { %v4066_v16 = vpop.eup %4065  ;;  %v2566_v40 = vpop.xlane.xlu1 %2565  ;;  %2786 = vmatprep.subr.mxu0 %v5360_v7  ;;  %v2759_v4 = vld [vmem:[#allocation7 + $0x68] sm:$0xff] }
 0x567   : > { %2726 = vst.msk [vmem:[#allocation7 + $0x48] sm:$0xff] %vm818_vm8, %v2674_v35  ;;  %v2673_v21 = vmul.f32 %v4066_v16, %v4600_v11  ;;  %4079 = vtanh.f32 %v2566_v40  ;;  %2787 = vmatpush1.msra.mxu0 %v2759_v4  ;;  %v5364_v35 = vld [vmem:[#allocation10_spill] sm:$0xff]  ;;  %v5365_v4 = vld [vmem:[#allocation11_spill] sm:$0xff] }
 0x568   : > { %v4068_v1 = vpop.eup %4067  ;;  %2788 = vmatprep.subr.mxu0 %v5360_v7  ;;  %v2563_v46 = vpop.xlane.xlu0 %2562  ;;  %v2758_v6 = vld [vmem:[#allocation7 + $0x60] sm:$0xff] }
 0x569   : > { %2725 = vst.msk [vmem:[#allocation7 + $0x40] sm:$0xff] %vm818_vm8, %v2673_v21  ;;  %v2672_v5 = vmul.f32 %v4068_v1, %v4580_v59  ;;  %4081 = vtanh.f32 %v2563_v46  ;;  %2789 = vmatpush1.msra.mxu0 %v2758_v6  ;;  %v5366_v6 = vld [vmem:[#allocation8_spill] sm:$0xff] }
 0x56a   : > { %v4070_v23 = vpop.eup %4069  ;;  %2790 = vmatprep.subr.mxu0 %v5360_v7  ;;  %v2757_v55 = vld [vmem:[#allocation7 + $0x58] sm:$0xff] }
 0x56b   : > { %2724 = vst.msk [vmem:[#allocation7 + $0x38] sm:$0xff] %vm818_vm8, %v2672_v5  ;;  %v2671_v11 = vmul.f32 %v4070_v23, %v4587_v0  ;;  %2791 = vmatpush1.msra.mxu0 %v2757_v55 }
 0x56c   : > { %v4072_v22 = vpop.eup %4071  ;;  %2792 = vmatprep.subr.mxu0 %v5360_v7  ;;  %v2756_v19 = vld [vmem:[#allocation7 + $0x50] sm:$0xff] }
 0x56d   : > { %2723 = vst.msk [vmem:[#allocation7 + $0x30] sm:$0xff] %vm818_vm8, %v2671_v11  ;;  %v2670_v56 = vmul.f32 %v4072_v22, %v4566_v49  ;;  %2793 = vmatpush1.msra.mxu0 %v2756_v19  ;;  %v5367_v11 = vld [vmem:[#allocation9_spill] sm:$0xff] }
 0x56e   : > { %v4074_v59 = vpop.eup %4073  ;;  %2794 = vmatprep.subr.mxu0 %v5360_v7  ;;  %v2755_v45 = vld [vmem:[#allocation7 + $0x48] sm:$0xff] }
 0x56f   : > { %2722 = vst.msk [vmem:[#allocation7 + $0x28] sm:$0xff] %vm818_vm8, %v2670_v56  ;;  %v2669_v2 = vmul.f32 %v4074_v59, %v4573_v54  ;;  %2795 = vmatpush1.msra.mxu0 %v2755_v45 }
 0x570   : > { %v4076_v0 = vpop.eup %4075  ;;  %2796 = vmatprep.subr.mxu0 %v5360_v7  ;;  %v2754_v13 = vld [vmem:[#allocation7 + $0x40] sm:$0xff] }
 0x571   : > { %2721 = vst.msk [vmem:[#allocation7 + $0x20] sm:$0xff] %vm818_vm8, %v2669_v2  ;;  %v2668_v61 = vmul.f32 %v4076_v0, %v4551_v39  ;;  %2797 = vmatpush1.msra.mxu0 %v2754_v13  ;;  %v963_v2 = vld [vmem:[%s5361_s28] sm:$0xff]  ;;  %v966_v13 = vld [vmem:[%s5361_s28 + $0x18] sm:$0xff] }
 0x572   : > { %v4078_v49 = vpop.eup %4077  ;;  %2798 = vmatprep.subr.mxu0 %v5360_v7  ;;  %v2753_v25 = vld [vmem:[#allocation7 + $0x38] sm:$0xff] }
 0x573   : > { %2720 = vst.msk [vmem:[#allocation7 + $0x18] sm:$0xff] %vm818_vm8, %v2668_v61  ;;  %v2667_v41 = vmul.f32 %v4078_v49, %v4559_v44  ;;  %2799 = vmatpush1.msra.mxu0 %v2753_v25  ;;  %v965_v61 = vld [vmem:[%s5361_s28 + $0x10] sm:$0xff]  ;;  %v968_v49 = vld [vmem:[%s5361_s28 + $0x28] sm:$0xf]  ;;  %v967_v25 = vld [vmem:[%s5361_s28 + $0x20] sm:$0xf] }
 0x574   : > { %v4080_v54 = vpop.eup %4079  ;;  %2800 = vmatprep.subr.mxu0 %v5360_v7  ;;  %v2752_v48 = vld [vmem:[#allocation7 + $0x30] sm:$0xff] }
 0x575   : > { %2719 = vst.msk [vmem:[#allocation7 + $0x10] sm:$0xff] %vm818_vm8, %v2667_v41  ;;  %v2666_v17 = vmul.f32 %v4080_v54, %v4539_v29  ;;  %2801 = vmatpush1.msra.mxu0 %v2752_v48  ;;  %v2914_v41 = vld [vmem:[%s5323_s16] sm:$0xff]  ;;  %v2913_v54 = vld [vmem:[%s5322_s15 + $0x8] sm:$0xff] }
 0x576   : > { %v4082_v39 = vpop.eup %4081  ;;  %2802 = vmatprep.subr.mxu0 %v5360_v7  ;;  %v2751_v58 = vld [vmem:[#allocation7 + $0x28] sm:$0xff]  ;;  %3823 = vmatpush3.msra.mxu1 %v2914_v41 }
 0x577   : > { %2718 = vst.msk [vmem:[#allocation7 + $0x8] sm:$0xff] %vm818_vm8, %v2666_v17  ;;  %v2665_v20 = vmul.f32 %v4082_v39, %v4545_v34  ;;  %2803 = vmatpush1.msra.mxu0 %v2751_v58  ;;  %3846 = vmatprep.subr.mxu1 %v5360_v7  ;;  %v2912_v48 = vld [vmem:[%s5322_s15] sm:$0xff]  ;;  %v5213_v39 = vld [vmem:[#allocation2 + $0x8] sm:$0xff]  ;;  %v5219_v58 = vld [vmem:[#allocation2 + $0x10] sm:$0xf] }
 0x578   : > { %2804 = vmatprep.subr.mxu0 %v5360_v7  ;;  %v2750_v44 = vld [vmem:[#allocation7 + $0x20] sm:$0xff]  ;;  %v5207_v17 = vld [vmem:[#allocation2] sm:$0xff] }
 0x579   : > { %2717 = vst.msk [vmem:[#allocation7] sm:$0xff] %vm818_vm8, %v2665_v20  ;;  %2805 = vmatpush1.msra.mxu0 %v2750_v44  ;;  %v2743_v20 = vld [vmem:[#allocation4] sm:$0xff]  ;;  %v3453_v41 = vld [vmem:[%s5326_s19] ss:$0 sm:$0xff] }
 0x57a   : > { %2806 = vmatprep.subr.mxu0 %v5360_v7  ;;  %v2749_v47 = vld [vmem:[#allocation7 + $0x18] sm:$0xff] }
 0x57b   : > { %2807 = vmatpush1.msra.mxu0 %v2749_v47 }
 0x57c   : > { %2808 = vmatprep.subr.mxu0 %v5360_v7  ;;  %v2748_v29 = vld [vmem:[#allocation7 + $0x10] sm:$0xff] }
 0x57d   : > { %2809 = vmatpush1.msra.mxu0 %v2748_v29 }
 0x57e   : > { %2810 = vmatprep.subr.mxu0 %v5360_v7  ;;  %v2747_v63 = vld [vmem:[#allocation7 + $0x8] sm:$0xff] }
 0x57f   : > { %2811 = vmatpush1.msra.mxu0 %v2747_v63  ;;  %v2744_v63 = vld [vmem:[#allocation4 + $0x8] sm:$0xff] }
 0x580   : > { %2812 = vmatprep.subr.mxu0 %v5360_v7  ;;  %v2746_v34 = vld [vmem:[#allocation7] sm:$0xff] }
 0x581   : > { %2813 = vmatpush1.msra.mxu0 %v2746_v34 }
 0x582   : > { %2826 = vmatprep.subr.mxu0 %v5360_v7 }
 0x593   : > { %v2638_v30 = vpop.xlane.xlu1 %2637 }
 0x594   : > { %4083 = vtanh.f32 %v2638_v30 }
 0x595   : > { %v2635_v8 = vpop.xlane.xlu0 %2634 }
 0x596   : > { %4085 = vtanh.f32 %v2635_v8 }
 0x597   : > { %v2632_v36 = vpop.xlane.xlu1 %2631 }
 0x598   : > { %4087 = vtanh.f32 %v2632_v36  ;;  %v2745_v36 = vld [vmem:[#allocation4 + $0x10] sm:$0xf] }
 0x599   : > { %v2629_v32 = vpop.xlane.xlu0 %2628 }
 0x59a   : > { %4089 = vtanh.f32 %v2629_v32 }
 0x59b   : > { %v2626_v53 = vpop.xlane.xlu1 %2625 }
 0x59c   : > { %4091 = vtanh.f32 %v2626_v53 }
 0x59d   : > { %v2623_v3 = vpop.xlane.xlu0 %2622 }
 0x59e   : > { %4093 = vtanh.f32 %v2623_v3 }
 0x59f   : > { %v2620_v27 = vpop.xlane.xlu1 %2619 }
 0x5a0   : > { %4095 = vtanh.f32 %v2620_v27 }
 0x5a1   : > { %v4084_v10 = vpop.eup %4083  ;;  %v2617_v50 = vpop.xlane.xlu0 %2616 }
 0x5a2   : > { %v2690_v28 = vmul.f32 %v4084_v10, %v4706_v24  ;;  %4097 = vtanh.f32 %v2617_v50 }
 0x5a3   : > { %v4086_v14 = vpop.eup %4085  ;;  %v2614_v37 = vpop.xlane.xlu1 %2613 }
 0x5a4   : > { %2742 = vst.msk [vmem:[#allocation7 + $0xc8] sm:$0xff] %vm818_vm8, %v2690_v28  ;;  %v2689_v18 = vmul.f32 %v4086_v14, %v4716_v38  ;;  %4099 = vtanh.f32 %v2614_v37 }
 0x5a5   : > { %v4088_v42 = vpop.eup %4087  ;;  %v2611_v62 = vpop.xlane.xlu0 %2610 }
 0x5a6   : > { %2741 = vst.msk [vmem:[#allocation7 + $0xc0] sm:$0xff] %vm818_vm8, %v2689_v18  ;;  %v2688_v52 = vmul.f32 %v4088_v42, %v4691_v57  ;;  %4101 = vtanh.f32 %v2611_v62 }
 0x5a7   : > { %v4090_v51 = vpop.eup %4089  ;;  %v2882_v53 = vpop.permute.xlu1 %2881 }
 0x5a8   : > { %2740 = vst.msk [vmem:[#allocation7 + $0xb8] sm:$0xff] %vm818_vm8, %v2688_v52  ;;  %v2687_v24 = vmul.f32 %v4090_v51, %v4698_v9 }
 0x5a9   : > { %v4092_v31 = vpop.eup %4091 }
 0x5aa   : > { %2739 = vst.msk [vmem:[#allocation7 + $0xb0] sm:$0xff] %vm818_vm8, %v2687_v24  ;;  %v2686_v15 = vmul.f32 %v4092_v31, %v5362_v60 }
 0x5ab   : > { %v4094_v26 = vpop.eup %4093  ;;  %v2771_v38 = vld [vmem:[#allocation7 + $0xc8] sm:$0xff]  ;;  %v2892_v18 = vpop.permute.xlu1 %2891 }
 0x5ac   : > { %2738 = vst.msk [vmem:[#allocation7 + $0xa8] sm:$0xff] %vm818_vm8, %v2686_v15  ;;  %v2685_v33 = vmul.f32 %v4094_v26, %v5363_v12  ;;  %2827 = vmatpush2.msra.mxu0 %v2771_v38  ;;  %v3103_v26 = vld [vmem:[%s5325_s18 + $0x18] sm:$0xff]  ;;  %v3102_v38 = vld [vmem:[%s5325_s18 + $0x10] sm:$0xff]  ;;  %v3101_v12 = vld [vmem:[%s5325_s18 + $0x8] sm:$0xff] }
 0x5ad   : > { %v4096_v43 = vpop.eup %4095  ;;  %2828 = vmatprep.subr.mxu0 %v5360_v7  ;;  %v2770_v57 = vld [vmem:[#allocation7 + $0xc0] sm:$0xff]  ;;  %v2887_v28 = vpop.permute.xlu0 %2886 }
 0x5ae   : > { %2737 = vst.msk [vmem:[#allocation7 + $0xa0] sm:$0xff] %vm818_vm8, %v2685_v33  ;;  %v2684_v9 = vmul.f32 %v4096_v43, %v5364_v35  ;;  %2829 = vmatpush2.msra.mxu0 %v2770_v57  ;;  %v3100_v33 = vld [vmem:[%s5325_s18] sm:$0xff]  ;;  %v4112_v57 = vld [vmem:[#allocation3] sm:$0xff] }
 0x5af   : > { %v4098_v16 = vpop.eup %4097  ;;  %2830 = vmatprep.subr.mxu0 %v5360_v7  ;;  %v2769_v40 = vld [vmem:[#allocation7 + $0xb8] sm:$0xff] }
 0x5b0   : > { %2736 = vst.msk [vmem:[#allocation7 + $0x98] sm:$0xff] %vm818_vm8, %v2684_v9  ;;  %v2683_v21 = vmul.f32 %v4098_v16, %v5365_v4  ;;  %2831 = vmatpush2.msra.mxu0 %v2769_v40  ;;  %v4113_v16 = vld [vmem:[#allocation3 + $0x8] sm:$0xff] }
 0x5b1   : > { %v4100_v1 = vpop.eup %4099  ;;  %2832 = vmatprep.subr.mxu0 %v5360_v7  ;;  %v2768_v46 = vld [vmem:[#allocation7 + $0xb0] sm:$0xff] }
 0x5b2   : > { %2735 = vst.msk [vmem:[#allocation7 + $0x90] sm:$0xff] %vm818_vm8, %v2683_v21  ;;  %v2682_v5 = vmul.f32 %v4100_v1, %v5366_v6  ;;  %2833 = vmatpush2.msra.mxu0 %v2768_v46  ;;  %v4114_v21 = vld [vmem:[#allocation3 + $0x10] sm:$0xf]  ;;  %v3449_v6 = vld [vmem:[%s5324_s17] ss:$0 sm:$0xff] }
 0x5b3   : > { %v4102_v23 = vpop.eup %4101  ;;  %2834 = vmatprep.subr.mxu0 %v5360_v7  ;;  %v2767_v55 = vld [vmem:[#allocation7 + $0xa8] sm:$0xff] }
 0x5b4   : > { %2734 = vst.msk [vmem:[#allocation7 + $0x88] sm:$0xff] %vm818_vm8, %v2682_v5  ;;  %v2681_v22 = vmul.f32 %v4102_v23, %v5367_v11  ;;  %2835 = vmatpush2.msra.mxu0 %v2767_v55 }
 0x5b5   : > { %2836 = vmatprep.subr.mxu0 %v5360_v7  ;;  %v2766_v19 = vld [vmem:[#allocation7 + $0xa0] sm:$0xff] }
 0x5b6   : > { %2733 = vst.msk [vmem:[#allocation7 + $0x80] sm:$0xff] %vm818_vm8, %v2681_v22  ;;  %2837 = vmatpush2.msra.mxu0 %v2766_v19 }
 0x5b7   : > { %2838 = vmatprep.subr.mxu0 %v5360_v7  ;;  %v2765_v56 = vld [vmem:[#allocation7 + $0x98] sm:$0xff] }
 0x5b8   : > { %2839 = vmatpush2.msra.mxu0 %v2765_v56 }
 0x5b9   : > { %2840 = vmatprep.subr.mxu0 %v5360_v7  ;;  %v2764_v59 = vld [vmem:[#allocation7 + $0x90] sm:$0xff] }
 0x5ba   : > { %2841 = vmatpush2.msra.mxu0 %v2764_v59 }
 0x5bb   : > { %2842 = vmatprep.subr.mxu0 %v5360_v7  ;;  %v2763_v45 = vld [vmem:[#allocation7 + $0x88] sm:$0xff] }
 0x5bc   : > { %2843 = vmatpush2.msra.mxu0 %v2763_v45 }
 0x5bd   : > { %2844 = vmatprep.subr.mxu0 %v5360_v7  ;;  %v2762_v0 = vld [vmem:[#allocation7 + $0x80] sm:$0xff] }
 0x5be   : > { %2845 = vmatpush2.msra.mxu0 %v2762_v0 }
 0x5bf   : > { %2847 = vmatmul.mubr.f32.vlgmr.msra.gmra.mxu0 %v963_v2  ;;  %3833 = vmatprep.subr.mxu0 %v5360_v7 }
 0x5c0   : > { %3441 = vmatprep.mubr.msk.f32.mxu0 %vm2772_vm13, %v966_v13  ;;  %3834 = vmatpush3.msra.mxu0 %v2913_v54 }
 0x5c1   : > { %3835 = vmatprep.subr.mxu0 %v5360_v7 }
 0x5c2   : > { %3836 = vmatpush3.msra.mxu0 %v2912_v48 }
 0x5c3   : > { %2852 = vmatmul.mubr.f32.gmra.mxu0 %v965_v61 }
 0x5c4   : > { %3442 = vmatprep.mubr.msk.f32.mxu0 %vm2772_vm13, %v968_v49 }
 0x5c7   : > { %2857 = vmatmul.mubr.f32.gmra.mxu0 %v967_v25 }
 0x5c8   : > { %3837 = vmatprep.mubr.msk.f32.mxu0 %vm4140_vm5, %v5360_v7 }
 0x5cb   : > { %3838 = vmatmul.mubr.msk.f32.vlgmr.msra.gmra.mxu0 %vm711_vm4, %v5207_v17 }
 0x5cc   : > { %3840 = vmatprep.mubr.msk.f32.mxu0 %vm4140_vm5, %v5360_v7 }
 0x5cf   : > { %3841 = vmatmul.mubr.msk.f32.gmra.mxu0 %vm711_vm4, %v5213_v39 }
 0x5d0   : > { %3843 = vmatprep.mubr.msk.f32.mxu0 %vm4140_vm5, %v5360_v7 }
 0x5d3   : > { %3844 = vmatmul.mubr.msk.f32.gmra.mxu0 %vm711_vm4, %v5219_v58 }
 0x67f   : > { %v2848_v44 = vpop.f32.mrf.mxu0 }
 0x680   : > { %v2862_v47 = vadd.f32 %v2848_v44, %v2743_v20 }
 0x681   : > { %v2850_v29 = vpop.f32.mrf.mxu0 }
 0x682   : > { %2866 = vst.msk [vmem:[#allocation4] sm:$0xff] %vm698_vm14, %v2862_v47 }
 0x683   : > { %v2853_v34 = vpop.f32.mrf.mxu0 }
 0x684   : > { %v2863_v30 = vadd.f32 %v2853_v34, %v2744_v63 }
 0x685   : > { %v2855_v8 = vpop.f32.mrf.mxu0 }
 0x686   : > { %2867 = vst.msk [vmem:[#allocation4 + $0x8] sm:$0xff] %vm698_vm14, %v2863_v30 }
 0x687   : > { %v2858_v32 = vpop.f32.mrf.mxu0 }
 0x688   : > { %v2864_v3 = vadd.f32 %v2858_v32, %v2745_v36 }
 0x689   : > { %v2860_v27 = vpop.f32.mrf.mxu0  ;;  %v2873_v10 = vld [vmem:[#allocation4] sm:$0xff] }
 0x68a   : > { %2869 = vst.msk [vmem:[#allocation4 + $0x10] sm:$0xf] %vm701_vm15, %v2864_v3  ;;  %3825 = vmatmul.mubr.msk.f32.vlgmr.msra.gmra.mxu1 %vm801_vm7, %v2873_v10  ;;  %v2894_v50 = vmul.f32 %v2882_v53, %v2873_v10 }
 0x68b   : > { %3827 = vmatprep.mubr.msk.f32.mxu1 %vm4140_vm5, %v5360_v7  ;;  %v3073_v52 = vpop.f32.mrf.mxu0  ;;  %3847 = vmatpush3.msra.mxu1 %v3103_v26 }
 0x68c   : > { %2900 = vrot.lane.b32.xlu1 %v2894_v50, %s5368_s2  ;;  %3848 = vmatprep.subr.mxu1 %v5360_v7 }
 0x68d   : > { %v2874_v14 = vld [vmem:[#allocation4 + $0x8] sm:$0xff]  ;;  %v3839_v51 = vpop.f32.mrf.mxu0  ;;  %3849 = vmatpush3.msra.mxu1 %v3102_v38 }
 0x68e   : > { %3828 = vmatmul.mubr.msk.f32.gmra.mxu1 %vm801_vm7, %v2874_v14  ;;  %v2895_v37 = vmul.f32 %v2887_v28, %v2874_v14  ;;  %3850 = vmatprep.subr.mxu1 %v5360_v7 }
 0x68f   : > { %3830 = vmatprep.mubr.msk.f32.mxu1 %vm4140_vm5, %v5360_v7  ;;  %v3078_v24 = vpop.f32.mrf.mxu0  ;;  %3851 = vmatpush3.msra.mxu1 %v3101_v12 }
 0x690   : > { %2902 = vrot.lane.b32.xlu1 %v2895_v37, %s5368_s2  ;;  %3852 = vmatprep.subr.mxu1 %v5360_v7 }
 0x691   : > { %v2875_v42 = vld [vmem:[#allocation4 + $0x10] sm:$0xf]  ;;  %v3842_v31 = vpop.f32.mrf.mxu0  ;;  %3853 = vmatpush3.msra.mxu1 %v3100_v33 }
 0x692   : > { %3831 = vmatmul.mubr.msk.f32.gmra.mxu1 %vm801_vm7, %v2875_v42  ;;  %v2896_v62 = vmul.f32 %v2892_v18, %v2875_v42 }
 0x693   : > { %3854 = vmatprep.mubr.msk.f32.mxu1 %vm4140_vm5, %v5360_v7  ;;  %v3083_v60 = vpop.f32.mrf.mxu0 }
 0x694   : > { %2904 = vrot.lane.b32.xlu1 %v2896_v62, %s5368_s2 }
 0x695   : > { %v3845_v15 = vpop.f32.mrf.mxu0 }
 0x6fe   : > { %v2901_v43 = vpop.permute.xlu1 %2900 }
 0x6ff   : > { %v2909_v35 = vadd.f32 %v4112_v57, %v2901_v43 }
 0x701   : > { %3206 = vst.msk [vmem:[#allocation3] sm:$0xff] %vm1685_vm12, %v2909_v35 }
 0x702   : > { %v2903_v9 = vpop.permute.xlu1 %2902 }
 0x703   : > { %v2910_v40 = vadd.f32 %v4113_v16, %v2903_v9 }
 0x705   : > { %3207 = vst.msk [vmem:[#allocation3 + $0x8] sm:$0xff] %vm1685_vm12, %v2910_v40 }
 0x706   : > { %v2905_v4 = vpop.permute.xlu1 %2904 }
 0x707   : > { %v2911_v1 = vadd.f32 %v4114_v21, %v2905_v4 }
 0x709   : > { %3209 = vst.msk [vmem:[#allocation3 + $0x10] sm:$0xf] %vm3208_vm0, %v2911_v1 }
 0x70c   : > { %v3220_v53 = vld [vmem:[#allocation3 + $0x8] sm:$0xff] (%p3214_p5) }
 0x70d   : > { %3223 = vst.msk [vmem:[%s5327_s20 + $0x8] sm:$0xff] (%p3214_p5), %vm1685_vm12, %v3220_v53 }
 0x710   : > { %v3221_v32 = vld [vmem:[#allocation3 + $0x10] sm:$0xf] (%p3214_p5) }
 0x711   : > { %3225 = vst.msk [vmem:[%s5327_s20 + $0x10] sm:$0xf] (%p3214_p5), %vm3208_vm0, %v3221_v32 }
 0x74a   : > { %v2993_v46 = vpop.f32.mrf.mxu1 }
 0x74b   : > { %v3074_v5 = vadd.f32 %v3073_v52, %v2993_v46 }
 0x74c   : > { %v3826_v23 = vpop.f32.mrf.mxu1 }
 0x74d   : > { %v3094_v55 = vadd.f32 %v3449_v6, %v3074_v5 }
 0x74e   : > { %v2998_v11 = vpop.f32.mrf.mxu1 }
 0x74f   : > { %4103 = vtanh.f32 %v3094_v55  ;;  %v3079_v22 = vadd.f32 %v3078_v24, %v2998_v11 }
 0x750   : > { %v3829_v19 = vpop.f32.mrf.mxu1 }
 0x751   : > { %v3095_v56 = vadd.f32 %v3449_v6, %v3079_v22 }
 0x752   : > { %v3003_v59 = vpop.f32.mrf.mxu1 }
 0x753   : > { %4105 = vtanh.f32 %v3095_v56  ;;  %v3084_v45 = vadd.f32 %v3083_v60, %v3003_v59 }
 0x754   : > { %v3832_v2 = vpop.f32.mrf.mxu1 }
 0x755   : > { %v3096_v0 = vadd.f32 %v3449_v6, %v3084_v45 }
 0x757   : > { %4107 = vtanh.f32 %v3096_v0 }
 0x75c   : > { %v4104_v13 = vpop.eup %4103 }
 0x75d   : > { %3855 = vmatmul.mubr.msk.f32.vlgmr.msra.gmra.mxu1 %vm801_vm7, %v4104_v13 }
 0x75e   : > { %3857 = vmatprep.mubr.msk.f32.mxu1 %vm4140_vm5, %v5360_v7 }
 0x760   : > { %v4106_v61 = vpop.eup %4105 }
 0x761   : > { %3858 = vmatmul.mubr.msk.f32.gmra.mxu1 %vm801_vm7, %v4106_v61 }
 0x762   : > { %3860 = vmatprep.mubr.msk.f32.mxu1 %vm4140_vm5, %v5360_v7 }
 0x764   : > { %v4108_v49 = vpop.eup %4107 }
 0x765   : > { %3861 = vmatmul.mubr.msk.f32.gmra.mxu1 %vm801_vm7, %v4108_v49 }
 0x81d   : > { %v3179_v25 = vpop.f32.mrf.mxu1 }
 0x81e   : > { %v3193_v54 = vadd.f32 %v5207_v17, %v3179_v25 }
 0x81f   : > { %v3856_v48 = vpop.f32.mrf.mxu1 }
 0x820   : > { %v3203_v20 = vadd.f32 %v3453_v41, %v3193_v54 }
 0x821   : > { %v3184_v44 = vpop.f32.mrf.mxu1 }
 0x822   : > { %3210 = vst.msk [vmem:[#allocation2] sm:$0xff] %vm711_vm4, %v3203_v20  ;;  %v3194_v47 = vadd.f32 %v5213_v39, %v3184_v44  ;;  %v3219_v39 = vld [vmem:[#allocation3] sm:$0xff] (%p3214_p5) }
 0x823   : > { %v3859_v29 = vpop.f32.mrf.mxu1  ;;  %3222 = vst.msk [vmem:[%s5327_s20] sm:$0xff] (%p3214_p5), %vm1685_vm12, %v3219_v39 }
 0x824   : > { %v3204_v7 = vadd.f32 %v3453_v41, %v3194_v47 }
 0x825   : > { %v3189_v63 = vpop.f32.mrf.mxu1 }
 0x826   : > { %3211 = vst.msk [vmem:[#allocation2 + $0x8] sm:$0xff] %vm711_vm4, %v3204_v7  ;;  %v3195_v34 = vadd.f32 %v5219_v58, %v3189_v63  ;;  %3218 = sbr.rel (!%p3214_p5) target bundleno = 2214 (0x8a6), region = 116 }
 0x827   : > { %v3862_v30 = vpop.f32.mrf.mxu1 }
 0x828   : > { %v3205_v8 = vadd.f32 %v3453_v41, %v3195_v34 }
 0x829   : > { %v3226_v17 = vld [vmem:[#allocation2] sm:$0xff] (%p3214_p5) }
 0x82a   : > { %3213 = vst.msk [vmem:[#allocation2 + $0x10] sm:$0xf] %vm3212_vm1, %v3205_v8  ;;  %3232 = vrot.lane.b32.xlu0 (%p3214_p5), %v3226_v17, %s4144_s30 }
 0x82d   : > { %v3227_v3 = vld [vmem:[#allocation2 + $0x8] sm:$0xff] }
 0x82e   : > { %3234 = vrot.lane.b32.xlu0 %v3227_v3, %s4144_s30 }
 0x831   : > { %v3228_v36 = vld [vmem:[#allocation2 + $0x10] sm:$0xf] }
 0x832   : > { %3236 = vrot.lane.b32.xlu1 %v3228_v36, %s4144_s30 }
 0x89c   : > { %v3233_v58 = vpop.permute.xlu0 %3232 }
 0x89d   : > { %3242 = vst.msk [vmem:[%s5327_s20] sm:$0xff] %vm3241_vm2, %v3233_v58 }
 0x8a0   : > { %v3235_v10 = vpop.permute.xlu0 %3234 }
 0x8a1   : > { %3243 = vst.msk [vmem:[%s5327_s20 + $0x8] sm:$0xff] %vm3241_vm2, %v3235_v10 }
 0x8a4   : > { %v3237_v27 = vpop.permute.xlu1 %3236 }
 0x8a5   : > { %3245 = vst.msk [vmem:[%s5327_s20 + $0x10] sm:$0xf] %vm3244_vm3, %v3237_v27 }
 0x8a6 PF: > { %s30_s23 = sadd.s32 1, %s4137_s23   ;;  %s5369_s1 = smov %s4133_s22 }
 0x8a7   : > { %p27_p6 = scmp.ge.s32.totalorder %s30_s23, 5   ;;  %s5370_s22 = smov %s5372_s24 }
 0x8a9   :  { %29 = sbr.rel (!%p27_p6) target bundleno = 6 (0x6), region = 148 }

</bundles_post_ra>
